<compile_context>
chip_gen: v7x
topology: tpu7x:2x2x1
jax: 0.10.0
libtpu: 0.0.40
codegen_flags: <defaults>
</compile_context>

<pallas_src>
import functools
import math

import jax
import jax.numpy as jnp
from jax import lax
from jax.experimental import pallas as pl
from jax.experimental.pallas import tpu as pltpu

_MASK_VALUE = -1e6    # d2l masked_softmax fill value for masked (real) keys
_PAD_VALUE = -1e30    # fill for key positions created by padding K up to 128*


def _round_up(x, m):
    return ((x + m - 1) // m) * m


def _pad_to(x, shape):
    pads = [(0, t - s) for s, t in zip(x.shape, shape)]
    return jnp.pad(x, pads) if any(p for _, p in pads) else x


def _choose_tiles(Q, K, Hp, itemsize, budget_bytes):
    """Pick (Qp, Kp, tq, tk) so the live feat chunk (tq*tk*Hp*itemsize bytes)
    stays under `budget_bytes` — safe for the default scoped-VMEM limit on
    every TPU generation alongside the double-buffered K/V blocks."""
    Kp = _round_up(max(K, 1), 128)
    tk = 128
    tq = 128
    while tq > 8 and tq * tk * Hp * itemsize > budget_bytes:
        tq //= 2
    tq = min(tq, _round_up(max(Q, 1), 8))
    Qp = _round_up(max(Q, 1), tq)
    # If the budget allows, use fewer / larger K-chunks.
    while (tk * 2 <= Kp and Kp % (tk * 2) == 0
           and tq * (tk * 2) * Hp * itemsize <= budget_bytes):
        tk *= 2
    return Qp, Kp, tq, tk


def _make_kernel(*, tq, kp, tk, k_orig, has_attn, compute_dtype):
    n_chunks = kp // tk

    def kernel(vlmax_ref, q_ref, k_ref, v_ref, vl_ref,
               wq_ref, wk_ref, wv_ref, *rest):
        if has_attn:
            out_ref, attn_ref, scores_ref = rest
        else:
            out_ref, scores_ref = rest
            attn_ref = None

        # Max valid length over this (batch, query-tile), read from SMEM:
        # K-chunks entirely beyond it carry no probability mass -> skip their
        # EUP-bound tanh work (and the associated projection matmul).
        tile_id = pl.program_id(0) * pl.num_programs(1) + pl.program_id(1)
        max_vl = vlmax_ref[tile_id]

        # Query projection (MXU, f32 accumulate), once per tile; hoist the
        # broadcast operands out of the chunk loop.
        qh = jnp.dot(q_ref[0], wq_ref[...], preferred_element_type=jnp.float32)
        qh_b = qh.astype(compute_dtype)[:, None, :]              # (tq, 1, Hp)
        wv_b = wv_ref[...].astype(compute_dtype)[None, :, :]     # (1, 1, Hp)

        def compute_chunk(start):
            # Key projection for this chunk only (MXU).
            k_c = k_ref[0, start:start + tk, :]                  # (tk, Dk)
            kh = jnp.dot(k_c, wk_ref[...], preferred_element_type=jnp.float32)
            pre = qh_b + kh.astype(compute_dtype)[None, :, :]    # (tq, tk, Hp)
            feat = jnp.tanh(pre)                                 # EUP (bf16 on v6e/v7x)
            sc = jnp.sum((feat * wv_b).astype(jnp.float32), axis=-1)   # (tq, tk) f32
            scores_ref[:, start:start + tk] = sc

        # Static (unrolled) chunk loop; only a (tq, tk, Hp) chunk is live.
        for c in range(n_chunks):
            start = c * tk
            pl.when(start < max_vl)(functools.partial(compute_chunk, start))

        # Masked softmax over the full (tq, Kp) row.  Chunks that were skipped
        # hold stale values but are fully masked below (kidx >= valid there).
        kidx = lax.broadcasted_iota(jnp.int32, (tq, kp), 1)
        valid = vl_ref[0]                                        # (tq, 1) int32
        scores = scores_ref[...]
        scores = jnp.where(kidx < valid, scores, _MASK_VALUE)    # d2l convention
        scores = jnp.where(kidx < k_orig, scores, _PAD_VALUE)    # K-padding: weight 0
        m = jnp.max(scores, axis=-1, keepdims=True)
        p = jnp.exp(scores - m)
        denom = jnp.sum(p, axis=-1, keepdims=True)
        attn = p * pl.reciprocal(denom, approx=True)             # no per-lane divide

        if attn_ref is not None:
            attn_ref[0] = attn.astype(attn_ref.dtype)

        v = v_ref[0]                                             # (Kp, Dvp)
        out_ref[0] = jnp.dot(attn.astype(v.dtype), v,
                             preferred_element_type=jnp.float32).astype(out_ref.dtype)

    return kernel


def additive_attention_forward(queries, keys, values, valid_lens, params, *,
                               dropout_p=0.0,
                               return_attention_weights=True,
                               compute_dtype=jnp.float32,
                               feat_chunk_budget_bytes=4 * 1024 * 1024,
                               vmem_limit_bytes=None):
    """AdditiveAttention forward.

    queries (B,Q,Dq), keys (B,K,Dk), values (B,K,Dv);
    valid_lens: None | (B,) | (B,Q).
    Returns out (B,Q,Dv) and, if return_attention_weights, attn (B,Q,K).
    compute_dtype=jnp.bfloat16 enables the bf16 MXU/EUP fast path (v6e/v7x).
    """
    if dropout_p != 0.0:
        # TODO(synk): train-mode dropout on attention weights not reproduced.
        raise NotImplementedError("dropout_p must be 0.0")

    B, Q, Dq = queries.shape
    _, K, Dk = keys.shape
    _, _, Dv = values.shape
    W_q, W_k, w_v = params["W_q"], params["W_k"], params["w_v"]
    H = W_q.shape[1]

    cdt = jnp.dtype(compute_dtype)
    # Lane-density padding (outputs / elementwise stage last dims -> 128*).
    Hp = _round_up(H, 128)
    Dvp = _round_up(Dv, 128)
    Qp, Kp, tq, tk = _choose_tiles(Q, K, Hp, cdt.itemsize, feat_chunk_budget_bytes)
    nq = Qp // tq

    q_p = _pad_to(queries.astype(cdt), (B, Qp, Dq))
    k_p = _pad_to(keys.astype(cdt), (B, Kp, Dk))
    v_p = _pad_to(values.astype(cdt), (B, Kp, Dvp))
    wq_p = _pad_to(W_q.astype(cdt), (Dq, Hp))
    wk_p = _pad_to(W_k.astype(cdt), (Dk, Hp))
    wv_p = _pad_to(w_v.astype(cdt), (1, Hp))

    if valid_lens is None:
        vl = jnp.full((B, Q), K, jnp.int32)
    else:
        vl = valid_lens.astype(jnp.int32)
        if vl.ndim == 1:
            vl = jnp.broadcast_to(vl[:, None], (B, Q))
    vl = _pad_to(vl, (B, Qp))                       # padded query rows -> len 0
    # Per-(batch, query-tile) max valid length, scalar-prefetched into SMEM.
    vlmax = jnp.max(vl.reshape(B, nq, tq), axis=-1).reshape(B * nq)
    vl3 = vl.reshape(B, Qp, 1)

    kernel = _make_kernel(tq=tq, kp=Kp, tk=tk, k_orig=K,
                          has_attn=return_attention_weights, compute_dtype=cdt)

    out_shape = [jax.ShapeDtypeStruct((B, Qp, Dvp), jnp.float32)]
    out_specs = [pl.BlockSpec((1, tq, Dvp), lambda b, qi, vm: (b, qi, 0))]
    if return_attention_weights:
        out_shape.append(jax.ShapeDtypeStruct((B, Qp, Kp), jnp.float32))
        out_specs.append(pl.BlockSpec((1, tq, Kp), lambda b, qi, vm: (b, qi, 0)))

    grid_spec = pltpu.PrefetchScalarGridSpec(
        num_scalar_prefetch=1,
        grid=(B, nq),
        in_specs=[
            pl.BlockSpec((1, tq, Dq), lambda b, qi, vm: (b, qi, 0)),   # queries
            pl.BlockSpec((1, Kp, Dk), lambda b, qi, vm: (b, 0, 0)),    # keys (resident per batch)
            pl.BlockSpec((1, Kp, Dvp), lambda b, qi, vm: (b, 0, 0)),   # values (resident per batch)
            pl.BlockSpec((1, tq, 1), lambda b, qi, vm: (b, qi, 0)),    # valid_lens (per row)
            pl.BlockSpec((Dq, Hp), lambda b, qi, vm: (0, 0)),          # W_q
            pl.BlockSpec((Dk, Hp), lambda b, qi, vm: (0, 0)),          # W_k
            pl.BlockSpec((1, Hp), lambda b, qi, vm: (0, 0)),           # w_v
        ],
        out_specs=out_specs,
        scratch_shapes=[pltpu.VMEM((tq, Kp), jnp.float32)],            # full score row
    )

    results = pl.pallas_call(
        kernel,
        grid_spec=grid_spec,
        out_shape=out_shape,
        compiler_params=pltpu.CompilerParams(
            dimension_semantics=("parallel", "parallel"),
            vmem_limit_bytes=vmem_limit_bytes),
    )(vlmax, q_p, k_p, v_p, vl3, wq_p, wk_p, wv_p)

    out = results[0][:, :Q, :Dv]
    if return_attention_weights:
        return out, results[1][:, :Q, :K]
    return out


def init_params(key, query_dim, key_dim, num_hiddens):
    """Deterministic synthetic weights (nn.Linear(bias=False)-style uniform init)."""
    kq, kk, kv = jax.random.split(key, 3)
    sc = lambda f: 1.0 / math.sqrt(f)
    W_q = jax.random.uniform(kq, (query_dim, num_hiddens), jnp.float32,
                             -sc(query_dim), sc(query_dim))
    W_k = jax.random.uniform(kk, (key_dim, num_hiddens), jnp.float32,
                             -sc(key_dim), sc(key_dim))
    w_v = jax.random.uniform(kv, (1, num_hiddens), jnp.float32,
                             -sc(num_hiddens), sc(num_hiddens))
    return dict(W_q=W_q, W_k=W_k, w_v=w_v)


def reference_forward(queries, keys, values, valid_lens, params):
    """Pure-JAX reference mirroring the PyTorch AdditiveAttention.forward."""
    qh = queries @ params["W_q"]
    kh = keys @ params["W_k"]
    feat = jnp.tanh(qh[:, :, None, :] + kh[:, None, :, :])
    scores = jnp.einsum("bqkh,h->bqk", feat, params["w_v"][0])
    if valid_lens is not None:
        vl = valid_lens
        if vl.ndim == 1:
            vl = jnp.broadcast_to(vl[:, None], scores.shape[:2])
        kk = jnp.arange(scores.shape[-1])[None, None, :]
        scores = jnp.where(kk < vl[:, :, None], scores, _MASK_VALUE)
    attn = jax.nn.softmax(scores, axis=-1)
    out = jnp.einsum("bqk,bkd->bqd", attn, values)
    return out, attn


if __name__ == "__main__":
    kq, kk_, kv, kp_, kvl = jax.random.split(jax.random.PRNGKey(0), 5)

    B, Q, K, Dq, Dk, Dv, H = 2, 8, 16, 32, 16, 32, 32
    queries = jax.random.normal(kq, (B, Q, Dq), jnp.float32)
    keys = jax.random.normal(kk_, (B, K, Dk), jnp.float32)
    values = jax.random.normal(kv, (B, K, Dv), jnp.float32)
    params = init_params(kp_, Dq, Dk, H)

    def check(name, vlens, tol=5e-3, **kw):
        res = additive_attention_forward(queries, keys, values, vlens, params,
                                         return_attention_weights=True, **kw)
        out, attn = jax.block_until_ready(res)
        ref_o, ref_a = reference_forward(queries, keys, values, vlens, params)
        assert out.shape == (B, Q, Dv) and attn.shape == (B, Q, K), f"{name}: bad shapes"
        err = max(float(jnp.max(jnp.abs(out - ref_o))),
                  float(jnp.max(jnp.abs(attn - ref_a))))
        assert err < tol, f"config {name}: err={err}"

    # A: 1-D valid_lens (per-batch lengths), as in the d2l example.
    check("A", jnp.array([3, 11], jnp.int32))

    # B: no masking; also exercise the output-only (no attention weights) path.
    out_b = jax.block_until_ready(
        additive_attention_forward(queries, keys, values, None, params,
                                   return_attention_weights=False))
    ref_ob, _ = reference_forward(queries, keys, values, None, params)
    assert out_b.shape == (B, Q, Dv), "config B: bad shape"
    assert float(jnp.max(jnp.abs(out_b - ref_ob))) < 5e-3, "config B: mismatch"

    # C: 2-D valid_lens (per-query lengths).
    vl2 = jax.random.randint(kvl, (B, Q), 1, K + 1).astype(jnp.int32)
    check("C", vl2)

    # D: bf16 compute path (MXU + tanh in bf16, f32 accumulation), looser tol.
    check("D", jnp.array([3, 11], jnp.int32), tol=5e-2, compute_dtype=jnp.bfloat16)

    print("KERNEL_OK")
</pallas_src>

<mosaic_0001>
module attributes {stable_mosaic.version = 11 : i64} {
  func.func @kernel(%arg0: i32, %arg1: i32, %arg2: memref<2xi32, #tpu.memory_space<smem>>, %arg3: memref<1x8x32xf32, #tpu.memory_space<vmem>>, %arg4: memref<1x128x16xf32, #tpu.memory_space<vmem>>, %arg5: memref<1x128x128xf32, #tpu.memory_space<vmem>>, %arg6: memref<1x8x1xi32, #tpu.memory_space<vmem>>, %arg7: memref<32x128xf32, #tpu.memory_space<vmem>>, %arg8: memref<16x128xf32, #tpu.memory_space<vmem>>, %arg9: memref<1x128xf32, #tpu.memory_space<vmem>>, %arg10: memref<1x8x128xf32, #tpu.memory_space<vmem>>, %arg11: memref<1x8x128xf32, #tpu.memory_space<vmem>>, %arg12: memref<8x128xf32, #tpu.memory_space<vmem>>) attributes {dimension_semantics = [#tpu.dimension_semantics<parallel>, #tpu.dimension_semantics<parallel>], iteration_bounds = array<i64: 2, 1>, scalar_prefetch = 1 : i64, scratch_operands = 1 : i64, tpu.core_type = #tpu.core_type<tc>, window_params = [{transform_indices = @transform_0, window_bounds = array<i64: 1, 8, 32>}, {transform_indices = @transform_1, window_bounds = array<i64: 1, 128, 16>}, {transform_indices = @transform_2, window_bounds = array<i64: 1, 128, 128>}, {transform_indices = @transform_3, window_bounds = array<i64: 1, 8, 1>}, {pipeline_mode = #tpu.pipeline_mode<synchronous>, transform_indices = @transform_4, window_bounds = array<i64: 32, 128>}, {pipeline_mode = #tpu.pipeline_mode<synchronous>, transform_indices = @transform_5, window_bounds = array<i64: 16, 128>}, {pipeline_mode = #tpu.pipeline_mode<synchronous>, transform_indices = @transform_6, window_bounds = array<i64: 1, 128>}, {transform_indices = @transform_7, window_bounds = array<i64: 1, 8, 128>}, {transform_indices = @transform_8, window_bounds = array<i64: 1, 8, 128>}]} {
    %c1_i32 = arith.constant 1 : i32
    %0 = arith.muli %arg0, %c1_i32 : i32
    %1 = arith.addi %0, %arg1 : i32
    %2 = arith.index_cast %1 : i32 to index
    %3 = memref.load %arg2[%2] : memref<2xi32, #tpu.memory_space<smem>>
    %c0 = arith.constant 0 : index
    %c0_0 = arith.constant 0 : index
    %c0_1 = arith.constant 0 : index
    %4 = vector.load %arg3[%c0, %c0_0, %c0_1] : memref<1x8x32xf32, #tpu.memory_space<vmem>>, vector<1x8x32xf32>
    %5 = vector.shape_cast %4 : vector<1x8x32xf32> to vector<8x32xf32>
    %c0_2 = arith.constant 0 : index
    %c0_3 = arith.constant 0 : index
    %6 = vector.load %arg7[%c0_2, %c0_3] : memref<32x128xf32, #tpu.memory_space<vmem>>, vector<32x128xf32>
    %cst = arith.constant dense<0.000000e+00> : vector<8x128xf32>
    %7 = tpu.matmul %5, %6, %cst {dimension_numbers = #tpu.dot_dimension_numbers<[1], [0], [0], [1], [0, 0, 1, 1], [], []>} : vector<8x32xf32>, vector<32x128xf32>, vector<8x128xf32> -> vector<8x128xf32>
    %8 = vector.shape_cast %7 : vector<8x128xf32> to vector<8x1x128xf32>
    %c0_4 = arith.constant 0 : index
    %c0_5 = arith.constant 0 : index
    %9 = vector.load %arg9[%c0_4, %c0_5] : memref<1x128xf32, #tpu.memory_space<vmem>>, vector<1x128xf32>
    %10 = vector.shape_cast %9 : vector<1x128xf32> to vector<1x1x128xf32>
    %c0_i32 = arith.constant 0 : i32
    %11 = arith.cmpi sgt, %3, %c0_i32 : i32
    %12 = arith.extui %11 : i1 to i32
    %c0_i32_6 = arith.constant 0 : i32
    %13 = arith.cmpi ne, %12, %c0_i32_6 : i32
    scf.if %13 {
      %c0_26 = arith.constant 0 : index
      %c0_27 = arith.constant 0 : index
      %c0_28 = arith.constant 0 : index
      %45 = vector.load %arg4[%c0_26, %c0_27, %c0_28] : memref<1x128x16xf32, #tpu.memory_space<vmem>>, vector<1x128x16xf32>
      %46 = vector.shape_cast %45 : vector<1x128x16xf32> to vector<128x16xf32>
      %c0_29 = arith.constant 0 : index
      %c0_30 = arith.constant 0 : index
      %47 = vector.load %arg8[%c0_29, %c0_30] : memref<16x128xf32, #tpu.memory_space<vmem>>, vector<16x128xf32>
      %cst_31 = arith.constant dense<0.000000e+00> : vector<128x128xf32>
      %48 = tpu.matmul %46, %47, %cst_31 {dimension_numbers = #tpu.dot_dimension_numbers<[1], [0], [0], [1], [0, 0, 1, 1], [], []>} : vector<128x16xf32>, vector<16x128xf32>, vector<128x128xf32> -> vector<128x128xf32>
      %49 = vector.shape_cast %48 : vector<128x128xf32> to vector<1x128x128xf32>
      %50 = vector.broadcast %8 : vector<8x1x128xf32> to vector<8x128x128xf32>
      %51 = vector.broadcast %49 : vector<1x128x128xf32> to vector<8x128x128xf32>
      %52 = arith.addf %50, %51 : vector<8x128x128xf32>
      %53 = math.tanh %52 : vector<8x128x128xf32>
      %54 = vector.broadcast %10 : vector<1x1x128xf32> to vector<8x128x128xf32>
      %55 = arith.mulf %53, %54 : vector<8x128x128xf32>
      %cst_32 = arith.constant dense<0.000000e+00> : vector<8x128xf32>
      %56 = vector.multi_reduction <add>, %55, %cst_32 [2] : vector<8x128x128xf32> to vector<8x128xf32>
      %c0_33 = arith.constant 0 : index
      %c0_34 = arith.constant 0 : index
      %57 = vector.load %arg12[%c0_33, %c0_34] : memref<8x128xf32, #tpu.memory_space<vmem>>, vector<8x128xf32>
      tpu.vector_store %arg12[%c0_33, %c0_34], %56 {strides = array<i32>} : memref<8x128xf32, #tpu.memory_space<vmem>>, vector<8x128xf32>,
    } else {
    }
    %14 = tpu.iota {dimensions = array<i32: 1>} : vector<8x128xi32>
    %c0_7 = arith.constant 0 : index
    %c0_8 = arith.constant 0 : index
    %c0_9 = arith.constant 0 : index
    %15 = vector.load %arg6[%c0_7, %c0_8, %c0_9] : memref<1x8x1xi32, #tpu.memory_space<vmem>>, vector<1x8x1xi32>
    %16 = vector.shape_cast %15 : vector<1x8x1xi32> to vector<8x1xi32>
    %c0_10 = arith.constant 0 : index
    %c0_11 = arith.constant 0 : index
    %17 = vector.load %arg12[%c0_10, %c0_11] : memref<8x128xf32, #tpu.memory_space<vmem>>, vector<8x128xf32>
    %18 = vector.broadcast %16 : vector<8x1xi32> to vector<8x128xi32>
    %19 = arith.cmpi slt, %14, %18 : vector<8x128xi32>
    %cst_12 = arith.constant -1.000000e+06 : f32
    %20 = vector.broadcast %cst_12 : f32 to vector<8x128xf32>
    %21 = arith.select %19, %17, %20 : vector<8x128xi1>, vector<8x128xf32>
    %c16_i32 = arith.constant 16 : i32
    %22 = vector.broadcast %c16_i32 : i32 to vector<8x128xi32>
    %23 = arith.cmpi slt, %14, %22 : vector<8x128xi32>
    %cst_13 = arith.constant -1.000000e+30 : f32
    %24 = vector.broadcast %cst_13 : f32 to vector<8x128xf32>
    %25 = arith.select %23, %21, %24 : vector<8x128xi1>, vector<8x128xf32>
    %cst_14 = arith.constant dense<0xFF800000> : vector<8xf32>
    %26 = vector.multi_reduction <maximumf>, %25, %cst_14 [1] : vector<8x128xf32> to vector<8xf32>
    %27 = vector.shape_cast %26 : vector<8xf32> to vector<8x1xf32>
    %28 = vector.broadcast %27 : vector<8x1xf32> to vector<8x128xf32>
    %29 = arith.subf %25, %28 : vector<8x128xf32>
    %30 = math.exp %29 : vector<8x128xf32>
    %cst_15 = arith.constant dense<0.000000e+00> : vector<8xf32>
    %31 = vector.multi_reduction <add>, %30, %cst_15 [1] : vector<8x128xf32> to vector<8xf32>
    %32 = vector.shape_cast %31 : vector<8xf32> to vector<8x1xf32>
    %33 = tpu.reciprocal %32 {approx = true} : vector<8x1xf32> -> vector<8x1xf32>
    %34 = vector.broadcast %33 : vector<8x1xf32> to vector<8x128xf32>
    %35 = arith.mulf %30, %34 : vector<8x128xf32>
    %c0_16 = arith.constant 0 : index
    %c0_17 = arith.constant 0 : index
    %c0_18 = arith.constant 0 : index
    %36 = vector.load %arg11[%c0_16, %c0_17, %c0_18] : memref<1x8x128xf32, #tpu.memory_space<vmem>>, vector<1x8x128xf32>
    %37 = vector.shape_cast %36 : vector<1x8x128xf32> to vector<8x128xf32>
    %38 = vector.shape_cast %35 : vector<8x128xf32> to vector<1x8x128xf32>
    tpu.vector_store %arg11[%c0_16, %c0_17, %c0_18], %38 {strides = array<i32>} : memref<1x8x128xf32, #tpu.memory_space<vmem>>, vector<1x8x128xf32>,
    %c0_19 = arith.constant 0 : index
    %c0_20 = arith.constant 0 : index
    %c0_21 = arith.constant 0 : index
    %39 = vector.load %arg5[%c0_19, %c0_20, %c0_21] : memref<1x128x128xf32, #tpu.memory_space<vmem>>, vector<1x128x128xf32>
    %40 = vector.shape_cast %39 : vector<1x128x128xf32> to vector<128x128xf32>
    %cst_22 = arith.constant dense<0.000000e+00> : vector<8x128xf32>
    %41 = tpu.matmul %35, %40, %cst_22 {dimension_numbers = #tpu.dot_dimension_numbers<[1], [0], [0], [1], [0, 0, 1, 1], [], []>} : vector<8x128xf32>, vector<128x128xf32>, vector<8x128xf32> -> vector<8x128xf32>
    %c0_23 = arith.constant 0 : index
    %c0_24 = arith.constant 0 : index
    %c0_25 = arith.constant 0 : index
    %42 = vector.load %arg10[%c0_23, %c0_24, %c0_25] : memref<1x8x128xf32, #tpu.memory_space<vmem>>, vector<1x8x128xf32>
    %43 = vector.shape_cast %42 : vector<1x8x128xf32> to vector<8x128xf32>
    %44 = vector.shape_cast %41 : vector<8x128xf32> to vector<1x8x128xf32>
    tpu.vector_store %arg10[%c0_23, %c0_24, %c0_25], %44 {strides = array<i32>} : memref<1x8x128xf32, #tpu.memory_space<vmem>>, vector<1x8x128xf32>,
    return
  }
  func.func @transform_0(%arg0: i32, %arg1: i32, %arg2: memref<2xi32, #tpu.memory_space<smem>>) -> (i32, i32, i32) {
    %c0_i32 = arith.constant 0 : i32
    %c0_i32_0 = arith.constant 0 : i32
    return %arg0, %arg1, %c0_i32 : i32, i32, i32
  }
  func.func @transform_1(%arg0: i32, %arg1: i32, %arg2: memref<2xi32, #tpu.memory_space<smem>>) -> (i32, i32, i32) {
    %c0_i32 = arith.constant 0 : i32
    %c0_i32_0 = arith.constant 0 : i32
    %c0_i32_1 = arith.constant 0 : i32
    return %arg0, %c0_i32, %c0_i32_0 : i32, i32, i32
  }
  func.func @transform_2(%arg0: i32, %arg1: i32, %arg2: memref<2xi32, #tpu.memory_space<smem>>) -> (i32, i32, i32) {
    %c0_i32 = arith.constant 0 : i32
    %c0_i32_0 = arith.constant 0 : i32
    %c0_i32_1 = arith.constant 0 : i32
    return %arg0, %c0_i32, %c0_i32_0 : i32, i32, i32
  }
  func.func @transform_3(%arg0: i32, %arg1: i32, %arg2: memref<2xi32, #tpu.memory_space<smem>>) -> (i32, i32, i32) {
    %c0_i32 = arith.constant 0 : i32
    %c0_i32_0 = arith.constant 0 : i32
    return %arg0, %arg1, %c0_i32 : i32, i32, i32
  }
  func.func @transform_4(%arg0: i32, %arg1: i32, %arg2: memref<2xi32, #tpu.memory_space<smem>>) -> (i32, i32) {
    %c0_i32 = arith.constant 0 : i32
    %c0_i32_0 = arith.constant 0 : i32
    %c0_i32_1 = arith.constant 0 : i32
    return %c0_i32, %c0_i32_0 : i32, i32
  }
  func.func @transform_5(%arg0: i32, %arg1: i32, %arg2: memref<2xi32, #tpu.memory_space<smem>>) -> (i32, i32) {
    %c0_i32 = arith.constant 0 : i32
    %c0_i32_0 = arith.constant 0 : i32
    %c0_i32_1 = arith.constant 0 : i32
    return %c0_i32, %c0_i32_0 : i32, i32
  }
  func.func @transform_6(%arg0: i32, %arg1: i32, %arg2: memref<2xi32, #tpu.memory_space<smem>>) -> (i32, i32) {
    %c0_i32 = arith.constant 0 : i32
    %c0_i32_0 = arith.constant 0 : i32
    %c0_i32_1 = arith.constant 0 : i32
    return %c0_i32, %c0_i32_0 : i32, i32
  }
  func.func @transform_7(%arg0: i32, %arg1: i32, %arg2: memref<2xi32, #tpu.memory_space<smem>>) -> (i32, i32, i32) {
    %c0_i32 = arith.constant 0 : i32
    %c0_i32_0 = arith.constant 0 : i32
    return %arg0, %arg1, %c0_i32 : i32, i32, i32
  }
  func.func @transform_8(%arg0: i32, %arg1: i32, %arg2: memref<2xi32, #tpu.memory_space<smem>>) -> (i32, i32, i32) {
    %c0_i32 = arith.constant 0 : i32
    %c0_i32_0 = arith.constant 0 : i32
    return %arg0, %arg1, %c0_i32 : i32, i32, i32
  }
}

</mosaic_0001>

<bundles_post_ra>
// kernel: tpu_custom_call.1
= control target key start
LH: loop header
LB: loop body
LE: loop exit
PB: predicated region body
PF: predicated region fallthrough
CT: control target
= control target key end

     0   :  { %s4628_s0 = inlined_call_operand.vmem [shape: s32[2], index: 0, kind: input, shape index: {}]   ;;  %s4629_s1 = inlined_call_operand.vmem [shape: f32[2,8,32], index: 1, kind: input, shape index: {}]   ;;  %s4630_s2 = inlined_call_operand.vmem [shape: f32[2,128,16], index: 2, kind: input, shape index: {}]   ;;  %s4631_s3 = inlined_call_operand.vmem [shape: f32[2,128,128], index: 3, kind: input, shape index: {}]   ;;  %s4632_s4 = inlined_call_operand.vmem [shape: s32[2,8,1], index: 4, kind: input, shape index: {}]   ;;  %s4633_s5 = inlined_call_operand.vmem [shape: f32[32,128], index: 5, kind: input, shape index: {}]   ;;  %s4634_s6 = inlined_call_operand.vmem [shape: f32[16,128], index: 6, kind: input, shape index: {}]   ;;  %s4635_s7 = inlined_call_operand.vmem [shape: f32[1,128], index: 7, kind: input, shape index: {}]   ;;  %s4636_s8 = inlined_call_operand.hbm [shape: f32[2,8,128], index: 8, kind: output, shape index: {0}]   ;;  %s4637_s9 = inlined_call_operand.hbm [shape: f32[2,8,128], index: 9, kind: output, shape index: {1}]  }
   0x1   :  { %4651 = sst [smem:[#allocation37_spill]] %s4633_s5  ;;  %s15_s11 = sshll.u32 %s4628_s0, 4  ;;  %s16_s11 = int_to_ptr.vmem [resolvable:$true] %s15_s11 }
   0x2   :  { %s3058_s12 = scalar_lea.vmem %s16_s11, 16  ;;  %p3063_p1 = scmp.lt.s32.totalorder %s16_s11, %s16_s11 }
   0x3   :  { %p3059_p0 = scmp.ne.s32.totalorder %s16_s11, %s3058_s12  ;;  %p3064_p2 = scmp.lt.s32.totalorder %s3058_s12, %s3058_s12 }
   0x5   :  { %p3065_p3 = por %p3064_p2, %p3063_p1 }
   0x7   :  { %p3066_p4 = pnand %p3065_p3, %p3059_p0 }
   0x9   :  { %3069 = shalt.err (!%p3066_p4)  }
   0xa   :  { %s3184_s13 = smov [#allocation4]  }
   0xb   :  { %18 = dma.vmem_to_smem %s16_s11, 16, %s3184_s13, [#allocation3] }
   0xc   :  { %3150 = dma.done.wait [#allocation3], 16 }
   0xd   :  { %3151 = vsyncadd [#allocation3], 4294967280 }
   0xe   :  { %20 = sfence }
   0xf   :  { %21 = vsyncpa [#allocation6], 0 }
  0x10   :  { %23 = vsyncpa [#allocation6 + $0x1], 0 }
  0x11   :  { %24 = vsyncpa [#allocation8], 0 }
  0x12   :  { %26 = vsyncpa [#allocation8 + $0x1], 0  ;;  %s3245_s14 = smov 0   ;;  %s3247_s0 = smov 0  }
  0x13   :  { %s3249_s15 = smov 0   ;;  %s3251_s16 = smov 0  }
  0x14   :  { %s3253_s17 = smov 0   ;;  %s3255_s18 = smov 0  }
  0x15 LB: > { %4652 = sst [smem:[#allocation12_spill]] %s3170_s15  ;;  %s2541_s19 = sadd.s32 4294967295, %s3182_s18   ;;  %s3182_s18 = sphi %s3255_s18, %s32_s18   ;;  %s3178_s17 = sphi %s3253_s17, %s4729_s17   ;;  %s3174_s16 = sphi %s3251_s16, %s4728_s16   ;;  %s3170_s15 = sphi %s3249_s15, %s4727_s15   ;;  %s3166_s0 = sphi %s3247_s0, %s4731_s0   ;;  %s3162_s14 = sphi %s3245_s14, %s4730_s14  }
  0x16   : > { %4653 = sst [smem:[#allocation13_spill]] %s3178_s17  ;;  %s2542_s20 = sadd.s32 4294967294, %s3182_s18  }
  0x17   : > { %s44_s21 = sadd.s32 1, %s3178_s17  ;;  %s224_s22 = sadd.s32 1, %s3170_s15 }
  0x18   : > { %p46_p5 = scmp.ge.s32.totalorder %s44_s21, 2  ;;  %p234_p6 = scmp.ne.s32.totalorder %s3170_s15, %s3166_s0 }
  0x19   : > { %p235_p7 = scmp.eq.s32.totalorder %s2541_s19, 1  ;;  %p240_p8 = scmp.ne.s32.totalorder %s3166_s0, %s3162_s14 }
  0x1a   : > { %s4733_s21 = smov (%p46_p5, %s44_s21), 0  ;;  %p241_p10 = scmp.eq.s32.totalorder %s2542_s20, 1 }
  0x1b   : > { %4654 = sst [smem:[#allocation14_spill]] %s4733_s21  ;;  %p3285_p9 = por %p235_p7, %p234_p6 }
  0x1c   : > { %s219_s24 = ssub.s32 %s3178_s17, %s4733_s21  ;;  %p2545_p11 = scmp.ge.s32.totalorder %s3182_s18, 1 }
  0x1d   : > { %p222_p12 = scmp.eq.s32.totalorder %s219_s24, 0  ;;  %p3292_p13 = por %p241_p10, %p240_p8 }
  0x1e   : > { %p332_p0 = scmp.lt.s32.totalorder %s3182_s18, 3 }
  0x1f   : > { %s3298_s26 = scalar_select %p222_p12, %s3170_s15, %s224_s22  }
  0x20   : > { %p333_p1 = pnand %p2545_p11, %p332_p0 }
  0x21   : > { %4657 = sst [smem:[#allocation15_spill]] %s3298_s26  ;;  %s3301_s27 = sand.u32 (!%p333_p1), 1, %s3166_s0   ;;  %v4643_v3 = vmov (!%p333_p1), 0.0|0.0   ;;  %vm3186_vm0 = vmmov (!%p333_p1), 0   ;;  %v4642_v6 = vmov (!%p333_p1), 0.0   ;;  %vm421_vm1 = vcmask (!%p333_p1), 261120  }
  0x22   : > { %336 = sbr.rel (%p333_p1) target bundleno = 1581 (0x62d), region = 48  ;;  %s3304_s28 = sld [smem:[#allocation4 + %s3174_s16]] (!%p333_p1)  ;;  %2695 = vmatprep.subr.bf16.mxu0 (!%p333_p1), %v4643_v3  ;;  %2629 = vmatprep.mubr.msk.f32.mxu0 (!%p333_p1), %vm3186_vm0, %v4642_v6  ;;  %v3346_v9 = vld [vmem:[%s4635_s7] ss:$0 sm:$0xff] (!%p333_p1)  ;;  %v3188_v10 = vmov (!%p333_p1), 1966171168   ;;  %v4641_v12 = vlaneseq (!%p333_p1) }
  0x23   : > { %s4658_s5 = sld [smem:[#allocation37_spill]] (!%p333_p1)  ;;  %p390_p2 = scmp.lt.s32.totalorder (!%p333_p1), %s3174_s16, 1  ;;  %v498_v11 = vunpack.c.l.s4 (!%p333_p1), %v3188_v10 }
  0x24   : > { %v3349_v14 = vshrl.u32 (!%p333_p1), %v4641_v12, 7 }
  0x25   : > { %v499_v13 = vunpack.c.0.s8 (!%p333_p1), %v498_v11 }
  0x27   : > { %v502_v15 = vsub.s32 (!%p333_p1), %v499_v13, %v3349_v14 }
  0x28   : > { %p2555_p3 = scmp.le.s32.totalorder (!%p333_p1), %s3304_s28, 0 }
  0x29   : > { %v417_v0 = vld [vmem:[%s4658_s5] sm:$0xff]  ;;  %v418_v1 = vld [vmem:[%s4658_s5 + $0x8] sm:$0xff]  ;;  %v419_v2 = vld [vmem:[%s4658_s5 + $0x10] sm:$0xff]  ;;  %s391_s24 = scalar_select %p390_p2, %s3174_s16, 1 }
  0x2a   : > { %v2696_v4 = vpack.c.bf16 %v418_v1, %v417_v0  ;;  %v420_v5 = vld [vmem:[%s4658_s5 + $0x18] sm:$0xff]  ;;  %s4659_s5 = sshll.u32 %s3301_s27, 3 }
  0x2b   : > { %v2699_v7 = vpack.c.bf16 %v420_v5, %v419_v2  ;;  %s2548_s29 = sshll.u32 %s391_s24, 3  ;;  %s2579_s30 = sshll.u32 %s391_s24, 7 }
  0x2c   : > { %2697 = vmatpush3.bf16.msra.mxu0 %v2696_v4  ;;  %s396_s12 = scalar_lea.vmem %s4629_s1, %s2548_s29  ;;  %s3331_s22 = scalar_lea.vmem %s4630_s2, %s2579_s30 }
  0x2d   : > { %2698 = vmatprep.subr.bf16.mxu0 %v4643_v3  ;;  %s3336_s21 = scalar_lea.vmem %s4631_s3, %s2579_s30  ;;  %s3341_s15 = scalar_lea.vmem %s4632_s4, %s2548_s29  ;;  %v416_v8 = vld [vmem:[%s396_s12] sm:$0xff] }
  0x2e   : > { %s3370_s17 = scalar_lea.vmem [#allocation5], %s4659_s5  ;;  %s4660_s26 = smov %s4659_s5 }
  0x2f   : > { %s3374_s19 = scalar_lea.vmem [#allocation7], %s4660_s26 }
  0x30   : > { %2700 = vmatpush3.bf16.msra.mxu0 %v2699_v7 }
  0x33   : > { %2630 = vmatmul.mubr.msk.f32.vlgmr.msra.gmra.mrb[0].mxu0 %vm421_vm1, %v416_v8 }
 0x106   : > { %v491_v16 = vpop.f32.mrb[0].mxu0 }
 0x107   : > { %v496_v17 = vcombine.high %v491_v16, %v491_v16  ;;  %v503_v18 = vrot.slane %v491_v16, %v502_v15  ;;  %v2631_v19 = vpop.f32.mrb[1].mxu0 }
 0x109   : > { %v510_v20 = vrot.slane %v496_v17, %v502_v15  ;;  %v511_v21 = vcombine.high %v503_v18, %v503_v18  ;;  %v3352_v22 = vrot.slane %v503_v18, %v502_v15  ;;  %549 = sbr.rel (%p2555_p3) target bundleno = 909 (0x38d), region = 52 }
 0x10b   : > { %v512_v23 = vcombine.high %v510_v20, %v510_v20  ;;  %v3354_v24 = vrot.slane %v510_v20, %v502_v15  ;;  %v3356_v25 = vrot.slane %v511_v21, %v502_v15  ;;  %v541_v26 = vcombine.high %v3352_v22, %v3352_v22 }
 0x10d   : > { %v3360_v27 = vrot.slane %v512_v23, %v502_v15  ;;  %v542_v28 = vcombine.high %v3354_v24, %v3354_v24  ;;  %v543_v29 = vcombine.high %v3356_v25, %v3356_v25 }
 0x10f   : > { %v544_v30 = vcombine.high %v3360_v27, %v3360_v27 }
 0x110   : > { %v566_v31 = vld [vmem:[%s4634_s6] sm:$0xff]  ;;  %v567_v32 = vld [vmem:[%s4634_s6 + $0x8] sm:$0xff]  ;;  %vm568_vm2 = vcmask 130048   ;;  %v552_v38 = vld [vmem:[%s3331_s22 + $0x10] sm:$0xff]  ;;  %v764_v50 = vsub.s32 0, %v3349_v14  ;;  %vm1587_vm3 = vcmask 130112  }
 0x111   : > { %v550_v33 = vld [vmem:[%s3331_s22] sm:$0xff]  ;;  %v2701_v34 = vpack.c.bf16 %v567_v32, %v566_v31  ;;  %v551_v36 = vld [vmem:[%s3331_s22 + $0x8] sm:$0xff]  ;;  %v560_v39 = vld [vmem:[%s3331_s22 + $0x50] sm:$0xff]  ;;  %vm1594_vm4 = vcmask 195712   ;;  %vm1601_vm5 = vcmask 261312   ;;  %vm1608_vm6 = vcmask 326912  }
 0x112   : > { %2636 = vmatprep.mubr.msk.f32.mxu0 %vm568_vm2, %v550_v33  ;;  %v558_v35 = vld [vmem:[%s3331_s22 + $0x40] sm:$0xff]  ;;  %v559_v37 = vld [vmem:[%s3331_s22 + $0x48] sm:$0xff]  ;;  %v553_v40 = vld [vmem:[%s3331_s22 + $0x18] sm:$0xff]  ;;  %v3417_v51 = vrot.slane %v3352_v22, %v764_v50  ;;  %v3420_v52 = vrot.slane %v3356_v25, %v764_v50  ;;  %v3422_v53 = vrot.slane %v542_v28, %v764_v50  ;;  %v3440_v62 = vrot.slane %v544_v30, %v764_v50 }
 0x113   : > { %2648 = vmatprep.mubr.msk.f32.mxu1 %vm568_vm2, %v558_v35  ;;  %2702 = vmatprep.subr.bf16.mxu0 %v2701_v34  ;;  %v561_v41 = vld [vmem:[%s3331_s22 + $0x58] sm:$0xff]  ;;  %v554_v42 = vld [vmem:[%s3331_s22 + $0x20] sm:$0xff]  ;;  %v555_v44 = vld [vmem:[%s3331_s22 + $0x28] sm:$0xff]  ;;  %v3451_v2 = vrot.slane %v541_v26, %v764_v50  ;;  %v3460_v8 = vrot.slane %v3360_v27, %v764_v50  ;;  %v3479_v20 = vrot.slane %v543_v29, %v764_v50  ;;  %vm1615_vm7 = vcmask 392512  }
 0x114   : > { %2729 = vmatprep.subr.bf16.mxu1 %v2701_v34  ;;  %2704 = vmatpush3.bf16.msra.mxu0 %v2701_v34  ;;  %v562_v43 = vld [vmem:[%s3331_s22 + $0x60] sm:$0xff]  ;;  %v563_v45 = vld [vmem:[%s3331_s22 + $0x68] sm:$0xff]  ;;  %v556_v46 = vld [vmem:[%s3331_s22 + $0x30] sm:$0xff]  ;;  %v3494_v35 = vrot.slane %v3354_v24, %v764_v50  ;;  %vm1622_vm8 = vcmask 458112   ;;  %vm1629_vm9 = vcmask 523712   ;;  %vm1636_vm10 = vcmask 589312  }
 0x115   : > { %2730 = vmatpush3.bf16.msra.mxu1 %v2701_v34  ;;  %v564_v47 = vld [vmem:[%s3331_s22 + $0x70] sm:$0xff]  ;;  %v557_v48 = vld [vmem:[%s3331_s22 + $0x38] sm:$0xff]  ;;  %vm1643_vm11 = vcmask 654912   ;;  %vm1650_vm12 = vcmask 720512   ;;  %vm1657_vm13 = vcmask 786112   ;;  %vm1664_vm14 = vcmask 851712  }
 0x116   : > { %v565_v49 = vld [vmem:[%s3331_s22 + $0x78] sm:$0xff]  ;;  %vm1671_vm15 = vcmask 917312   ;;  %vm1678_vm1 = vcmask 982912  }
 0x117   : > { %2637 = vmatmul.mubr.msk.f32.vlgmr.msra.gmra.mrb[0].mxu0 %vm568_vm2, %v551_v36 }
 0x118   : > { %2649 = vmatmul.mubr.msk.f32.vlgmr.msra.gmra.mrb[0].mxu1 %vm568_vm2, %v559_v37  ;;  %2639 = vmatprep.mubr.msk.f32.mxu0 %vm568_vm2, %v552_v38 }
 0x119   : > { %2651 = vmatprep.mubr.msk.f32.mxu1 %vm568_vm2, %v560_v39 }
 0x11b   : > { %2640 = vmatmul.mubr.msk.f32.gmra.mrb[2].mxu0 %vm568_vm2, %v553_v40 }
 0x11c   : > { %2652 = vmatmul.mubr.msk.f32.gmra.mrb[2].mxu1 %vm568_vm2, %v561_v41  ;;  %2642 = vmatprep.mubr.msk.f32.mxu0 %vm568_vm2, %v554_v42 }
 0x11d   : > { %2654 = vmatprep.mubr.msk.f32.mxu1 %vm568_vm2, %v562_v43 }
 0x11f   : > { %2643 = vmatmul.mubr.msk.f32.gmra.mrb[4].mxu0 %vm568_vm2, %v555_v44 }
 0x120   : > { %2655 = vmatmul.mubr.msk.f32.gmra.mrb[4].mxu1 %vm568_vm2, %v563_v45  ;;  %2645 = vmatprep.mubr.msk.f32.mxu0 %vm568_vm2, %v556_v46 }
 0x121   : > { %2657 = vmatprep.mubr.msk.f32.mxu1 %vm568_vm2, %v564_v47 }
 0x123   : > { %2646 = vmatmul.mubr.msk.f32.gmra.mrb[6].mxu0 %vm568_vm2, %v557_v48 }
 0x124   : > { %2658 = vmatmul.mubr.msk.f32.gmra.mrb[6].mxu1 %vm568_vm2, %v565_v49  ;;  %vm1685_vm2 = vcmask 1048512  }
 0x1ea   : > { %v3424_v54 = vpop.f32.mrb[0].mxu0 }
 0x1eb   : > { %v3426_v55 = vpop.f32.mrb[0].mxu1  ;;  %v3428_v56 = vpop.f32.mrb[1].mxu0  ;;  %v803_v59 = vadd.f32 %v3424_v54, %v3417_v51  ;;  %v819_v60 = vadd.f32 %v3424_v54, %v3420_v52  ;;  %v899_v61 = vadd.f32 %v3424_v54, %v3422_v53  ;;  %v915_v7 = vadd.f32 %v3424_v54, %v3440_v62 }
 0x1ec   : > { %v3430_v57 = vpop.f32.mrb[1].mxu1  ;;  %v811_v58 = vadd.f32 %v3426_v55, %v3417_v51  ;;  %v827_v1 = vadd.f32 %v3426_v55, %v3420_v52  ;;  %v835_v13 = vadd.f32 %v3424_v54, %v3451_v2  ;;  %v891_v17 = vadd.f32 %v3426_v55, %v3460_v8 }
 0x1ed   : > { %v843_v19 = vadd.f32 %v3426_v55, %v3451_v2  ;;  %v907_v23 = vadd.f32 %v3426_v55, %v3422_v53  ;;  %v851_v30 = vadd.f32 %v3424_v54, %v3479_v20  ;;  %v923_v29 = vadd.f32 %v3426_v55, %v3440_v62 }
 0x1ee   : > { %2797 = vtanh.f32 %v811_v58  ;;  %v3442_v63 = vpop.f32.mrb[2].mxu0  ;;  %v859_v34 = vadd.f32 %v3426_v55, %v3479_v20  ;;  %v802_v37 = vadd.f32 %v3417_v51, %v3428_v56  ;;  %v867_v41 = vadd.f32 %v3424_v54, %v3494_v35 }
 0x1ef   : > { %2799 = vtanh.f32 %v803_v59  ;;  %v3444_v0 = vpop.f32.mrb[2].mxu1  ;;  %v3453_v4 = vpop.f32.mrb[3].mxu0  ;;  %v810_v24 = vadd.f32 %v3417_v51, %v3430_v57  ;;  %v875_v46 = vadd.f32 %v3426_v55, %v3494_v35  ;;  %v818_v48 = vadd.f32 %v3420_v52, %v3428_v56 }
 0x1f0   : > { %2801 = vtanh.f32 %v819_v60  ;;  %v3455_v5 = vpop.f32.mrb[3].mxu1  ;;  %v883_v59 = vadd.f32 %v3424_v54, %v3460_v8  ;;  %v826_v55 = vadd.f32 %v3420_v52, %v3430_v57  ;;  %v834_v54 = vadd.f32 %v3451_v2, %v3428_v56 }
 0x1f1   : > { %2803 = vtanh.f32 %v899_v61 }
 0x1f2   : > { %v3462_v10 = vpop.f32.mrb[4].mxu0  ;;  %2805 = vtanh.f32 %v827_v1 }
 0x1f3   : > { %v3464_v11 = vpop.f32.mrb[4].mxu1  ;;  %v3468_v15 = vpop.f32.mrb[5].mxu0  ;;  %2807 = vtanh.f32 %v915_v7 }
 0x1f4   : > { %v3470_v16 = vpop.f32.mrb[5].mxu1  ;;  %2809 = vtanh.f32 %v835_v13  ;;  %v898_v13 = vadd.f32 %v3422_v53, %v3428_v56 }
 0x1f5   : > { %2811 = vtanh.f32 %v891_v17 }
 0x1f6   : > { %2813 = vtanh.f32 %v843_v19 }
 0x1f7   : > { %2815 = vtanh.f32 %v907_v23 }
 0x1f8   : > { %v2798_v18 = vpop.eup %2797  ;;  %2817 = vtanh.f32 %v851_v30 }
 0x1f9   : > { %v2800_v21 = vpop.eup %2799  ;;  %v1073_v22 = vmul.f32 %v2798_v18, %v3346_v9  ;;  %2819 = vtanh.f32 %v923_v29 }
 0x1fa   : > { %v2802_v26 = vpop.eup %2801  ;;  %v1065_v27 = vmul.f32 %v2800_v21, %v3346_v9  ;;  %2821 = vtanh.f32 %v859_v34 }
 0x1fb   : > { %v2804_v28 = vpop.eup %2803  ;;  %1210 = vadd.xlane.f32.xlu1 %v1073_v22  ;;  %v1081_v25 = vmul.f32 %v2802_v26, %v3346_v9  ;;  %2823 = vtanh.f32 %v802_v37  ;;  %v914_v22 = vadd.f32 %v3440_v62, %v3428_v56  ;;  %v842_v26 = vadd.f32 %v3451_v2, %v3430_v57 }
 0x1fc   : > { %1194 = vadd.xlane.f32.xlu0 %v1065_v27  ;;  %v2806_v31 = vpop.eup %2805  ;;  %v1161_v32 = vmul.f32 %v2804_v28, %v3346_v9  ;;  %2825 = vtanh.f32 %v867_v41 }
 0x1fd   : > { %v2808_v33 = vpop.eup %2807  ;;  %v1089_v36 = vmul.f32 %v2806_v31, %v3346_v9  ;;  %2827 = vtanh.f32 %v810_v24  ;;  %v850_v31 = vadd.f32 %v3479_v20, %v3428_v56 }
 0x1fe   : > { %v2810_v38 = vpop.eup %2809  ;;  %v1177_v39 = vmul.f32 %v2808_v33, %v3346_v9  ;;  %2829 = vtanh.f32 %v875_v46  ;;  %v805_v46 = vadd.f32 %v3442_v63, %v3417_v51 }
 0x1ff   : > { %1226 = vadd.xlane.f32.xlu1 %v1081_v25  ;;  %v2812_v40 = vpop.eup %2811  ;;  %v1097_v42 = vmul.f32 %v2810_v38, %v3346_v9  ;;  %2831 = vtanh.f32 %v818_v48  ;;  %v890_v25 = vadd.f32 %v3460_v8, %v3430_v57  ;;  %v858_v38 = vadd.f32 %v3479_v20, %v3430_v57 }
 0x200   : > { %1386 = vadd.xlane.f32.xlu0 %v1161_v32  ;;  %v2814_v43 = vpop.eup %2813  ;;  %v1153_v44 = vmul.f32 %v2812_v40, %v3346_v9  ;;  %2833 = vtanh.f32 %v883_v59  ;;  %v813_v59 = vadd.f32 %v3444_v0, %v3417_v51 }
 0x201   : > { %v2816_v45 = vpop.eup %2815  ;;  %v1105_v47 = vmul.f32 %v2814_v43, %v3346_v9  ;;  %2835 = vtanh.f32 %v826_v55  ;;  %v866_v43 = vadd.f32 %v3494_v35, %v3428_v56  ;;  %v3556_v55 = vpop.f32.mrb[6].mxu0 }
 0x202   : > { %v2818_v49 = vpop.eup %2817  ;;  %v1169_v50 = vmul.f32 %v2816_v45, %v3346_v9  ;;  %2837 = vtanh.f32 %v898_v13 }
 0x203   : > { %1242 = vadd.xlane.f32.xlu1 %v1089_v36  ;;  %v2820_v58 = vpop.eup %2819  ;;  %v1113_v60 = vmul.f32 %v2818_v49, %v3346_v9  ;;  %2839 = vtanh.f32 %v834_v54  ;;  %v906_v36 = vadd.f32 %v3422_v53, %v3430_v57  ;;  %v874_v49 = vadd.f32 %v3494_v35, %v3430_v57  ;;  %v3564_v54 = vpop.f32.mrb[7].mxu0 }
 0x204   : > { %1418 = vadd.xlane.f32.xlu0 %v1177_v39  ;;  %v2822_v61 = vpop.eup %2821  ;;  %v1185_v1 = vmul.f32 %v2820_v58, %v3346_v9  ;;  %2841 = vtanh.f32 %v914_v22 }
 0x205   : > { %v2824_v7 = vpop.eup %2823  ;;  %v1121_v17 = vmul.f32 %v2822_v61, %v3346_v9  ;;  %2843 = vtanh.f32 %v842_v26 }
 0x206   : > { %v2826_v18 = vpop.eup %2825  ;;  %v1064_v19 = vmul.f32 %v2824_v7, %v3346_v9  ;;  %2845 = vtanh.f32 %v890_v25  ;;  %v917_v25 = vadd.f32 %v3442_v63, %v3440_v62 }
 0x207   : > { %1258 = vadd.xlane.f32.xlu1 %v1097_v42  ;;  %v2828_v21 = vpop.eup %2827  ;;  %v1129_v23 = vmul.f32 %v2826_v18, %v3346_v9  ;;  %2847 = vtanh.f32 %v850_v31  ;;  %v922_v42 = vadd.f32 %v3440_v62, %v3430_v57  ;;  %v3566_v18 = vpop.f32.mrb[6].mxu1 }
 0x208   : > { %1370 = vadd.xlane.f32.xlu0 %v1153_v44  ;;  %v2830_v27 = vpop.eup %2829  ;;  %v1072_v28 = vmul.f32 %v2828_v21, %v3346_v9  ;;  %2849 = vtanh.f32 %v906_v36  ;;  %v3571_v21 = vpop.f32.mrb[7].mxu1  ;;  %v893_v36 = vadd.f32 %v3444_v0, %v3460_v8 }
 0x209   : > { %v2832_v30 = vpop.eup %2831  ;;  %v1137_v29 = vmul.f32 %v2830_v27, %v3346_v9  ;;  %2851 = vtanh.f32 %v858_v38 }
 0x20a   : > { %v2834_v32 = vpop.eup %2833  ;;  %v1080_v33 = vmul.f32 %v2832_v30, %v3346_v9  ;;  %2853 = vtanh.f32 %v922_v42 }
 0x20b   : > { %1274 = vadd.xlane.f32.xlu1 %v1105_v47  ;;  %v2836_v34 = vpop.eup %2835  ;;  %v1145_v37 = vmul.f32 %v2834_v32, %v3346_v9  ;;  %2855 = vtanh.f32 %v866_v43 }
 0x20c   : > { %1402 = vadd.xlane.f32.xlu0 %v1169_v50  ;;  %v2838_v39 = vpop.eup %2837  ;;  %v1088_v40 = vmul.f32 %v2836_v34, %v3346_v9  ;;  %2857 = vtanh.f32 %v805_v46  ;;  %v837_v34 = vadd.f32 %v3442_v63, %v3451_v2  ;;  %v925_v46 = vadd.f32 %v3444_v0, %v3440_v62 }
 0x20d   : > { %v2840_v41 = vpop.eup %2839  ;;  %v1160_v24 = vmul.f32 %v2838_v39, %v3346_v9  ;;  %2859 = vtanh.f32 %v874_v49 }
 0x20e   : > { %v2842_v44 = vpop.eup %2841  ;;  %v1096_v45 = vmul.f32 %v2840_v41, %v3346_v9  ;;  %2861 = vtanh.f32 %v813_v59  ;;  %v909_v41 = vadd.f32 %v3444_v0, %v3422_v53  ;;  %v812_v59 = vadd.f32 %v3417_v51, %v3455_v5 }
 0x20f   : > { %1290 = vadd.xlane.f32.xlu1 %v1113_v60  ;;  %v2844_v47 = vpop.eup %2843  ;;  %v1176_v48 = vmul.f32 %v2842_v44, %v3346_v9  ;;  %v853_v44 = vadd.f32 %v3442_v63, %v3479_v20 }
 0x210   : > { %1434 = vadd.xlane.f32.xlu0 %v1185_v1  ;;  %v2846_v50 = vpop.eup %2845  ;;  %v1104_v58 = vmul.f32 %v2844_v47, %v3346_v9  ;;  %v882_v1 = vadd.f32 %v3460_v8, %v3428_v56  ;;  %v901_v56 = vadd.f32 %v3442_v63, %v3422_v53 }
 0x211   : > { %v2848_v60 = vpop.eup %2847  ;;  %v1152_v61 = vmul.f32 %v2846_v50, %v3346_v9  ;;  %v861_v50 = vadd.f32 %v3444_v0, %v3479_v20 }
 0x212   : > { %v2850_v7 = vpop.eup %2849  ;;  %v1112_v57 = vmul.f32 %v2848_v60, %v3346_v9  ;;  %2863 = vtanh.f32 %v882_v1 }
 0x213   : > { %1306 = vadd.xlane.f32.xlu1 %v1121_v17  ;;  %v2852_v13 = vpop.eup %2851  ;;  %v821_v17 = vadd.f32 %v3442_v63, %v3420_v52 }
 0x214   : > { %1192 = vadd.xlane.f32.xlu0 %v1064_v19  ;;  %v1168_v19 = vmul.f32 %v2850_v7, %v3346_v9  ;;  %v2854_v22 = vpop.eup %2853  ;;  %v869_v7 = vadd.f32 %v3442_v63, %v3494_v35 }
 0x215   : > { %v2856_v26 = vpop.eup %2855  ;;  %2865 = vtanh.f32 %v821_v17  ;;  %v1184_v30 = vmul.f32 %v2854_v22, %v3346_v9  ;;  %v877_v22 = vadd.f32 %v3444_v0, %v3494_v35 }
 0x216   : > { %v2858_v27 = vpop.eup %2857  ;;  %2867 = vtanh.f32 %v901_v56 }
 0x217   : > { %1322 = vadd.xlane.f32.xlu1 %v1129_v23  ;;  %v1120_v23 = vmul.f32 %v2852_v13, %v3346_v9  ;;  %v2860_v31 = vpop.eup %2859  ;;  %v1067_v32 = vmul.f32 %v2858_v27, %v3346_v9  ;;  %v820_v13 = vadd.f32 %v3420_v52, %v3453_v4 }
 0x218   : > { %1208 = vadd.xlane.f32.xlu0 %v1072_v28  ;;  %v829_v28 = vadd.f32 %v3444_v0, %v3420_v52 }
 0x21a   : > { %2869 = vtanh.f32 %v829_v28 }
 0x21b   : > { %1338 = vadd.xlane.f32.xlu1 %v1137_v29  ;;  %v1128_v29 = vmul.f32 %v2856_v26, %v3346_v9  ;;  %2871 = vtanh.f32 %v917_v25  ;;  %v828_v26 = vadd.f32 %v3420_v52, %v3455_v5  ;;  %v885_v25 = vadd.f32 %v3442_v63, %v3460_v8 }
 0x21c   : > { %1224 = vadd.xlane.f32.xlu0 %v1080_v33  ;;  %v2862_v33 = vpop.eup %2861  ;;  %2873 = vtanh.f32 %v837_v34  ;;  %v804_v34 = vadd.f32 %v3417_v51, %v3453_v4  ;;  %v844_v63 = vadd.f32 %v3451_v2, %v3455_v5 }
 0x21d   : > { %v2864_v38 = vpop.eup %2863  ;;  %v1075_v39 = vmul.f32 %v2862_v33, %v3346_v9  ;;  %2875 = vtanh.f32 %v893_v36 }
 0x21f   : > { %1354 = vadd.xlane.f32.xlu1 %v1145_v37  ;;  %v1136_v37 = vmul.f32 %v2860_v31, %v3346_v9  ;;  %v2866_v42 = vpop.eup %2865 }
 0x220   : > { %1240 = vadd.xlane.f32.xlu0 %v1088_v40  ;;  %v845_v40 = vadd.f32 %v3444_v0, %v3451_v2  ;;  %v2868_v43 = vpop.eup %2867  ;;  %v836_v0 = vadd.f32 %v3451_v2, %v3453_v4 }
 0x222   : > { %2877 = vtanh.f32 %v845_v40  ;;  %v916_v40 = vadd.f32 %v3440_v62, %v3453_v4 }
 0x223   : > { %1384 = vadd.xlane.f32.xlu1 %v1160_v24  ;;  %v1144_v24 = vmul.f32 %v2864_v38, %v3346_v9  ;;  %2879 = vtanh.f32 %v909_v41 }
 0x224   : > { %1256 = vadd.xlane.f32.xlu0 %v1096_v45  ;;  %v1083_v45 = vmul.f32 %v2866_v42, %v3346_v9  ;;  %v2870_v47 = vpop.eup %2869  ;;  %2881 = vtanh.f32 %v853_v44  ;;  %v852_v42 = vadd.f32 %v3479_v20, %v3453_v4 }
 0x225   : > { %v2872_v49 = vpop.eup %2871  ;;  %2883 = vtanh.f32 %v925_v46 }
 0x226   : > { %v2874_v60 = vpop.eup %2873  ;;  %2885 = vtanh.f32 %v861_v50 }
 0x227   : > { %1416 = vadd.xlane.f32.xlu1 %v1176_v48  ;;  %v1163_v48 = vmul.f32 %v2868_v43, %v3346_v9  ;;  %v2876_v1 = vpop.eup %2875  ;;  %2887 = vtanh.f32 %v812_v59 }
 0x228   : > { %1272 = vadd.xlane.f32.xlu0 %v1104_v58  ;;  %v1091_v58 = vmul.f32 %v2870_v47, %v3346_v9  ;;  %2889 = vtanh.f32 %v869_v7  ;;  %v860_v47 = vadd.f32 %v3479_v20, %v3455_v5 }
 0x229   : > { %2891 = vtanh.f32 %v820_v13 }
 0x22a   : > { %2893 = vtanh.f32 %v877_v22  ;;  %v807_v22 = vadd.f32 %v3462_v10, %v3417_v51 }
 0x22b   : > { %1368 = vadd.xlane.f32.xlu1 %v1152_v61  ;;  %v1179_v61 = vmul.f32 %v2872_v49, %v3346_v9  ;;  %2895 = vtanh.f32 %v828_v26 }
 0x22c   : > { %1288 = vadd.xlane.f32.xlu0 %v1112_v57  ;;  %v1099_v57 = vmul.f32 %v2874_v60, %v3346_v9  ;;  %v2878_v17 = vpop.eup %2877  ;;  %2897 = vtanh.f32 %v885_v25  ;;  %v868_v60 = vadd.f32 %v3494_v35, %v3453_v4 }
 0x22d   : > { %v2880_v56 = vpop.eup %2879  ;;  %2899 = vtanh.f32 %v836_v0  ;;  %v900_v0 = vadd.f32 %v3422_v53, %v3453_v4 }
 0x22e   : > { %v2882_v27 = vpop.eup %2881  ;;  %v1171_v28 = vmul.f32 %v2880_v56, %v3346_v9  ;;  %2901 = vtanh.f32 %v804_v34  ;;  %v823_v34 = vadd.f32 %v3462_v10, %v3420_v52 }
 0x22f   : > { %1400 = vadd.xlane.f32.xlu1 %v1168_v19  ;;  %v1155_v19 = vmul.f32 %v2876_v1, %v3346_v9  ;;  %2903 = vtanh.f32 %v844_v63  ;;  %v887_v63 = vadd.f32 %v3462_v10, %v3460_v8 }
 0x230   : > { %1304 = vadd.xlane.f32.xlu0 %v1120_v23  ;;  %v1107_v23 = vmul.f32 %v2878_v17, %v3346_v9  ;;  %2905 = vtanh.f32 %v916_v40  ;;  %v876_v17 = vadd.f32 %v3494_v35, %v3455_v5  ;;  %v831_v40 = vadd.f32 %v3464_v11, %v3420_v52 }
 0x231   : > { %2907 = vtanh.f32 %v852_v42  ;;  %v903_v42 = vadd.f32 %v3462_v10, %v3422_v53 }
 0x233   : > { %1432 = vadd.xlane.f32.xlu1 %v1184_v30  ;;  %v2884_v30 = vpop.eup %2883 }
 0x234   : > { %1320 = vadd.xlane.f32.xlu0 %v1128_v29  ;;  %v1115_v29 = vmul.f32 %v2882_v27, %v3346_v9  ;;  %v2886_v31 = vpop.eup %2885  ;;  %v884_v27 = vadd.f32 %v3460_v8, %v3453_v4 }
 0x235   : > { %v2888_v33 = vpop.eup %2887  ;;  %v1123_v36 = vmul.f32 %v2886_v31, %v3346_v9 }
 0x236   : > { %v1074_v38 = vmul.f32 %v2888_v33, %v3346_v9 }
 0x237   : > { %1198 = vadd.xlane.f32.xlu1 %v1067_v32  ;;  %v1187_v32 = vmul.f32 %v2884_v30, %v3346_v9 }
 0x238   : > { %1336 = vadd.xlane.f32.xlu0 %v1136_v37  ;;  %v2890_v37 = vpop.eup %2889 }
 0x239   : > { %v1131_v41 = vmul.f32 %v2890_v37, %v3346_v9 }
 0x23b   : > { %1214 = vadd.xlane.f32.xlu1 %v1075_v39  ;;  %v2892_v39 = vpop.eup %2891 }
 0x23c   : > { %1352 = vadd.xlane.f32.xlu0 %v1144_v24  ;;  %v2894_v24 = vpop.eup %2893  ;;  %v1082_v43 = vmul.f32 %v2892_v39, %v3346_v9 }
 0x23d   : > { %v2896_v44 = vpop.eup %2895  ;;  %v1139_v46 = vmul.f32 %v2894_v24, %v3346_v9 }
 0x23e   : > { %v1090_v49 = vmul.f32 %v2896_v44, %v3346_v9 }
 0x23f   : > { %1230 = vadd.xlane.f32.xlu1 %v1083_v45  ;;  %v892_v45 = vadd.f32 %v3460_v8, %v3455_v5 }
 0x240   : > { %1390 = vadd.xlane.f32.xlu0 %v1163_v48  ;;  %v2898_v48 = vpop.eup %2897 }
 0x241   : > { %v2900_v50 = vpop.eup %2899  ;;  %2909 = vtanh.f32 %v892_v45  ;;  %v1147_v59 = vmul.f32 %v2898_v48, %v3346_v9 }
 0x242   : > { %2911 = vtanh.f32 %v860_v47  ;;  %v1098_v1 = vmul.f32 %v2900_v50, %v3346_v9  ;;  %v919_v47 = vadd.f32 %v3462_v10, %v3440_v62 }
 0x243   : > { %1246 = vadd.xlane.f32.xlu1 %v1091_v58  ;;  %v908_v58 = vadd.f32 %v3422_v53, %v3455_v5 }
 0x244   : > { %1422 = vadd.xlane.f32.xlu0 %v1179_v61  ;;  %v2902_v61 = vpop.eup %2901 }
 0x245   : > { %v2904_v7 = vpop.eup %2903  ;;  %2913 = vtanh.f32 %v908_v58  ;;  %v1066_v13 = vmul.f32 %v2902_v61, %v3346_v9  ;;  %v847_v58 = vadd.f32 %v3464_v11, %v3451_v2 }
 0x246   : > { %2915 = vtanh.f32 %v868_v60  ;;  %v1106_v56 = vmul.f32 %v2904_v7, %v3346_v9  ;;  %v855_v7 = vadd.f32 %v3462_v10, %v3479_v20 }
 0x247   : > { %1262 = vadd.xlane.f32.xlu1 %v1099_v57  ;;  %v924_v57 = vadd.f32 %v3440_v62, %v3455_v5  ;;  %v815_v5 = vadd.f32 %v3464_v11, %v3417_v51 }
 0x248   : > { %1374 = vadd.xlane.f32.xlu0 %v1155_v19  ;;  %v2906_v19 = vpop.eup %2905 }
 0x249   : > { %2917 = vtanh.f32 %v924_v57  ;;  %v1178_v26 = vmul.f32 %v2906_v19, %v3346_v9 }
 0x24a   : > { %2919 = vtanh.f32 %v876_v17 }
 0x24b   : > { %1278 = vadd.xlane.f32.xlu1 %v1107_v23  ;;  %v2908_v23 = vpop.eup %2907  ;;  %2921 = vtanh.f32 %v807_v22  ;;  %v863_v22 = vadd.f32 %v3464_v11, %v3479_v20 }
 0x24c   : > { %1406 = vadd.xlane.f32.xlu0 %v1171_v28  ;;  %v2910_v28 = vpop.eup %2909  ;;  %v1114_v30 = vmul.f32 %v2908_v23, %v3346_v9  ;;  %2923 = vtanh.f32 %v884_v27 }
 0x24d   : > { %v2912_v25 = vpop.eup %2911  ;;  %2925 = vtanh.f32 %v815_v5  ;;  %v871_v5 = vadd.f32 %v3462_v10, %v3494_v35 }
 0x24e   : > { %2927 = vtanh.f32 %v900_v0 }
 0x24f   : > { %1294 = vadd.xlane.f32.xlu1 %v1115_v29  ;;  %v1154_v29 = vmul.f32 %v2910_v28, %v3346_v9  ;;  %v2914_v31 = vpop.eup %2913  ;;  %2929 = vtanh.f32 %v823_v34  ;;  %v879_v34 = vadd.f32 %v3464_v11, %v3494_v35 }
 0x250   : > { %1438 = vadd.xlane.f32.xlu0 %v1187_v32  ;;  %v1122_v32 = vmul.f32 %v2912_v25, %v3346_v9  ;;  %v2916_v33 = vpop.eup %2915  ;;  %2931 = vtanh.f32 %v887_v63  ;;  %v822_v63 = vadd.f32 %v3420_v52, %v3468_v15 }
 0x251   : > { %2933 = vtanh.f32 %v831_v40  ;;  %v886_v40 = vadd.f32 %v3460_v8, %v3468_v15 }
 0x252   : > { %2935 = vtanh.f32 %v903_v42 }
 0x253   : > { %1310 = vadd.xlane.f32.xlu1 %v1123_v36  ;;  %v1170_v36 = vmul.f32 %v2914_v31, %v3346_v9  ;;  %v2918_v37 = vpop.eup %2917 }
 0x254   : > { %1212 = vadd.xlane.f32.xlu0 %v1074_v38  ;;  %v1130_v38 = vmul.f32 %v2916_v33, %v3346_v9  ;;  %v2920_v4 = vpop.eup %2919 }
 0x255   : > { %v2922_v39 = vpop.eup %2921  ;;  %v1138_v24 = vmul.f32 %v2920_v4, %v3346_v9 }
 0x256   : > { %v1069_v44 = vmul.f32 %v2922_v39, %v3346_v9 }
 0x257   : > { %1326 = vadd.xlane.f32.xlu1 %v1131_v41  ;;  %v1186_v41 = vmul.f32 %v2918_v37, %v3346_v9 }
 0x258   : > { %1228 = vadd.xlane.f32.xlu0 %v1082_v43  ;;  %v2924_v43 = vpop.eup %2923 }
 0x259   : > { %v2926_v45 = vpop.eup %2925  ;;  %v1146_v48 = vmul.f32 %v2924_v43, %v3346_v9 }
 0x25a   : > { %v1077_v50 = vmul.f32 %v2926_v45, %v3346_v9 }
 0x25b   : > { %1342 = vadd.xlane.f32.xlu1 %v1139_v46  ;;  %v839_v46 = vadd.f32 %v3462_v10, %v3451_v2 }
 0x25c   : > { %1244 = vadd.xlane.f32.xlu0 %v1090_v49  ;;  %v2928_v49 = vpop.eup %2927 }
 0x25d   : > { %2937 = vtanh.f32 %v839_v46  ;;  %v2930_v60 = vpop.eup %2929  ;;  %v1162_v61 = vmul.f32 %v2928_v49, %v3346_v9 }
 0x25e   : > { %2939 = vtanh.f32 %v919_v47  ;;  %v1085_v57 = vmul.f32 %v2930_v60, %v3346_v9  ;;  %v902_v47 = vadd.f32 %v3422_v53, %v3468_v15 }
 0x25f   : > { %1358 = vadd.xlane.f32.xlu1 %v1147_v59  ;;  %v895_v59 = vadd.f32 %v3464_v11, %v3460_v8  ;;  %2941 = vtanh.f32 %v847_v58 }
 0x260   : > { %1260 = vadd.xlane.f32.xlu0 %v1098_v1  ;;  %v2932_v1 = vpop.eup %2931 }
 0x261   : > { %2943 = vtanh.f32 %v895_v59  ;;  %v2934_v17 = vpop.eup %2933  ;;  %v1149_v19 = vmul.f32 %v2932_v1, %v3346_v9  ;;  %v918_v1 = vadd.f32 %v3440_v62, %v3468_v15 }
 0x262   : > { %2945 = vtanh.f32 %v855_v7  ;;  %v1093_v23 = vmul.f32 %v2934_v17, %v3346_v9 }
 0x263   : > { %1196 = vadd.xlane.f32.xlu1 %v1066_v13  ;;  %v911_v13 = vadd.f32 %v3464_v11, %v3422_v53 }
 0x264   : > { %1276 = vadd.xlane.f32.xlu0 %v1106_v56  ;;  %v2936_v56 = vpop.eup %2935 }
 0x265   : > { %2947 = vtanh.f32 %v911_v13  ;;  %v1165_v28 = vmul.f32 %v2936_v56, %v3346_v9  ;;  %v846_v13 = vadd.f32 %v3451_v2, %v3470_v16 }
 0x266   : > { %2949 = vtanh.f32 %v863_v22 }
 0x267   : > { %1420 = vadd.xlane.f32.xlu1 %v1178_v26  ;;  %v806_v26 = vadd.f32 %v3417_v51, %v3468_v15  ;;  %v2938_v27 = vpop.eup %2937 }
 0x268   : > { %1292 = vadd.xlane.f32.xlu0 %v1114_v30  ;;  %v2940_v30 = vpop.eup %2939  ;;  %v1101_v25 = vmul.f32 %v2938_v27, %v3346_v9 }
 0x269   : > { %2951 = vtanh.f32 %v806_v26  ;;  %v2942_v0 = vpop.eup %2941  ;;  %v1181_v31 = vmul.f32 %v2940_v30, %v3346_v9  ;;  %v894_v26 = vadd.f32 %v3460_v8, %v3470_v16  ;;  %v854_v30 = vadd.f32 %v3479_v20, %v3468_v15 }
 0x26a   : > { %2953 = vtanh.f32 %v871_v5  ;;  %v1109_v10 = vmul.f32 %v2942_v0, %v3346_v9 }
 0x26b   : > { %1372 = vadd.xlane.f32.xlu1 %v1154_v29  ;;  %v814_v29 = vadd.f32 %v3417_v51, %v3470_v16 }
 0x26c   : > { %1308 = vadd.xlane.f32.xlu0 %v1122_v32  ;;  %v2944_v32 = vpop.eup %2943 }
 0x26d   : > { %2955 = vtanh.f32 %v814_v29  ;;  %v2946_v37 = vpop.eup %2945 }
 0x26e   : > { %2957 = vtanh.f32 %v879_v34  ;;  %v1117_v42 = vmul.f32 %v2946_v37, %v3346_v9 }
 0x26f   : > { %1404 = vadd.xlane.f32.xlu1 %v1170_v36  ;;  %v2948_v4 = vpop.eup %2947  ;;  %2959 = vtanh.f32 %v822_v63  ;;  %v862_v63 = vadd.f32 %v3479_v20, %v3470_v16 }
 0x270   : > { %1324 = vadd.xlane.f32.xlu0 %v1130_v38  ;;  %v1157_v38 = vmul.f32 %v2944_v32, %v3346_v9  ;;  %v2950_v43 = vpop.eup %2949  ;;  %2961 = vtanh.f32 %v886_v40  ;;  %v910_v32 = vadd.f32 %v3422_v53, %v3470_v16 }
 0x271   : > { %v1125_v49 = vmul.f32 %v2950_v43, %v3346_v9  ;;  %v926_v43 = vadd.f32 %v3440_v62, %v3470_v16 }
 0x273   : > { %1436 = vadd.xlane.f32.xlu1 %v1186_v41  ;;  %v2952_v45 = vpop.eup %2951 }
 0x274   : > { %1340 = vadd.xlane.f32.xlu0 %v1138_v24  ;;  %v830_v24 = vadd.f32 %v3420_v52, %v3470_v16  ;;  %v2954_v58 = vpop.eup %2953  ;;  %v1068_v59 = vmul.f32 %v2952_v45, %v3346_v9 }
 0x276   : > { %2963 = vtanh.f32 %v830_v24 }
 0x277   : > { %1202 = vadd.xlane.f32.xlu1 %v1069_v44  ;;  %v1173_v44 = vmul.f32 %v2948_v4, %v3346_v9  ;;  %v2956_v60 = vpop.eup %2955  ;;  %2965 = vtanh.f32 %v902_v47  ;;  %v870_v47 = vadd.f32 %v3494_v35, %v3468_v15 }
 0x278   : > { %1356 = vadd.xlane.f32.xlu0 %v1146_v48  ;;  %v2958_v17 = vpop.eup %2957  ;;  %v1076_v56 = vmul.f32 %v2956_v60, %v3346_v9  ;;  %v809_v60 = vadd.f32 %v3556_v55, %v3417_v51 }
 0x279   : > { %v2960_v22 = vpop.eup %2959 }
 0x27a   : > { %v2962_v5 = vpop.eup %2961  ;;  %v1084_v29 = vmul.f32 %v2960_v22, %v3346_v9 }
 0x27b   : > { %1218 = vadd.xlane.f32.xlu1 %v1077_v50  ;;  %v838_v50 = vadd.f32 %v3451_v2, %v3468_v15 }
 0x27c   : > { %1388 = vadd.xlane.f32.xlu0 %v1162_v61 }
 0x27d   : > { %2967 = vtanh.f32 %v838_v50 }
 0x27e   : > { %2969 = vtanh.f32 %v918_v1 }
 0x27f   : > { %1234 = vadd.xlane.f32.xlu1 %v1085_v57  ;;  %v1133_v57 = vmul.f32 %v2954_v58, %v3346_v9  ;;  %2971 = vtanh.f32 %v846_v13 }
 0x280   : > { %1362 = vadd.xlane.f32.xlu0 %v1149_v19  ;;  %v3746_v19 = vand.u32 127, %v4641_v12  ;;  %v2964_v0 = vpop.eup %2963  ;;  %2973 = vtanh.f32 %v894_v26  ;;  %v817_v26 = vadd.f32 %v3566_v18, %v3417_v51 }
 0x281   : > { %2975 = vtanh.f32 %v854_v30  ;;  %v2966_v37 = vpop.eup %2965  ;;  %v1092_v4 = vmul.f32 %v2964_v0, %v3346_v9 }
 0x282   : > { %v3775_v40 = vsub.s32 %v3746_v19, %v3349_v14  ;;  %2977 = vtanh.f32 %v910_v32  ;;  %v1164_v45 = vmul.f32 %v2966_v37, %v3346_v9 }
 0x283   : > { %1250 = vadd.xlane.f32.xlu1 %v1093_v23  ;;  %2979 = vtanh.f32 %v862_v63 }
 0x284   : > { %1394 = vadd.xlane.f32.xlu0 %v1165_v28  ;;  %v1141_v28 = vmul.f32 %v2958_v17, %v3346_v9  ;;  %2981 = vtanh.f32 %v926_v43  ;;  %v878_v17 = vadd.f32 %v3494_v35, %v3470_v16 }
 0x285   : > { %2983 = vtanh.f32 %v870_v47 }
 0x286   : > { %2985 = vtanh.f32 %v809_v60  ;;  %v833_v60 = vadd.f32 %v3566_v18, %v3420_v52 }
 0x287   : > { %1266 = vadd.xlane.f32.xlu1 %v1101_v25  ;;  %v1582_v25 = vadd.s32 4294967288, %v3746_v19  ;;  %2987 = vtanh.f32 %v878_v17 }
 0x288   : > { %1426 = vadd.xlane.f32.xlu0 %v1181_v31  ;;  %v3706_v33 = vpop.xlane.xlu1 %1210  ;;  %2989 = vtanh.f32 %v817_v26 }
 0x289   : > { %v3710_v36 = vpop.xlane.xlu0 %1194 }
 0x28b   : > { %1282 = vadd.xlane.f32.xlu1 %v1109_v10  ;;  %v1148_v10 = vmul.f32 %v2962_v5, %v3346_v9 }
 0x28c   : > { %1378 = vadd.xlane.f32.xlu0 %v1157_v38  ;;  %v3716_v39 = vpop.xlane.xlu1 %1226  ;;  %v3770_v38 = vsub.s32 %v1582_v25, %v3349_v14 }
 0x28d   : > { %v3720_v41 = vpop.xlane.xlu0 %1386 }
 0x28e   : > { %v1586_v50 = vrot.slane %v3710_v36, %v3770_v38  ;;  %v1694_v0 = vrot.slane %v3716_v39, %v3770_v38 }
 0x28f   : > { %1298 = vadd.xlane.f32.xlu1 %v1117_v42  ;;  %v2968_v42 = vpop.eup %2967 }
 0x290   : > { %1410 = vadd.xlane.f32.xlu0 %v1173_v44  ;;  %v3726_v46 = vpop.xlane.xlu1 %1242 }
 0x291   : > { %v3730_v48 = vpop.xlane.xlu0 %1418 }
 0x293   : > { %1314 = vadd.xlane.f32.xlu1 %v1125_v49  ;;  %v2970_v49 = vpop.eup %2969 }
 0x294   : > { %1200 = vadd.xlane.f32.xlu0 %v1068_v59  ;;  %v3736_v61 = vpop.xlane.xlu1 %1258  ;;  %v1100_v59 = vmul.f32 %v2968_v42, %v3346_v9  ;;  %v2972_v1 = vpop.eup %2971  ;;  %v1180_v36 = vmul.f32 %v2970_v49, %v3346_v9  ;;  %v825_v42 = vadd.f32 %v3556_v55, %v3420_v52 }
 0x295   : > { %v3740_v7 = vpop.xlane.xlu0 %1370  ;;  %v1108_v22 = vmul.f32 %v2972_v1, %v3346_v9  ;;  %v2089_v1 = vrot.slane %v3720_v41, %v3770_v38 }
 0x296   : > { %4661 = vst [vmem:[#allocation16_spill] sm:$0xff] %v3740_v7 }
 0x297   : > { %1330 = vadd.xlane.f32.xlu1 %v1133_v57 }
 0x298   : > { %1216 = vadd.xlane.f32.xlu0 %v1076_v56  ;;  %v3749_v23 = vpop.xlane.xlu1 %1274  ;;  %v2974_v56 = vpop.eup %2973 }
 0x299   : > { %v3753_v27 = vpop.xlane.xlu0 %1402  ;;  %v1156_v25 = vmul.f32 %v2974_v56, %v3346_v9 }
 0x29b   : > { %1346 = vadd.xlane.f32.xlu1 %v1141_v28  ;;  %v2976_v28 = vpop.eup %2975 }
 0x29c   : > { %1232 = vadd.xlane.f32.xlu0 %v1084_v29  ;;  %v3760_v31 = vpop.xlane.xlu1 %1290  ;;  %v889_v29 = vadd.f32 %v3556_v55, %v3460_v8  ;;  %v2978_v16 = vpop.eup %2977 }
 0x29d   : > { %v3764_v34 = vpop.xlane.xlu0 %1434  ;;  %v2980_v63 = vpop.eup %2979  ;;  %v1172_v39 = vmul.f32 %v2978_v16, %v3346_v9 }
 0x29e   : > { %4662 = vst [vmem:[#allocation17_spill] sm:$0xff] %v3764_v34  ;;  %2991 = vtanh.f32 %v889_v29  ;;  %v1124_v47 = vmul.f32 %v2980_v63, %v3346_v9 }
 0x29f   : > { %1360 = vadd.xlane.f32.xlu1 %v1148_v10  ;;  %v1116_v10 = vmul.f32 %v2976_v28, %v3346_v9  ;;  %2993 = vtanh.f32 %v825_v42  ;;  %v897_v42 = vadd.f32 %v3566_v18, %v3460_v8 }
 0x2a0   : > { %1248 = vadd.xlane.f32.xlu0 %v1092_v4  ;;  %v3777_v24 = vpop.xlane.xlu1 %1306 }
 0x2a1   : > { %4663 = vst [vmem:[#allocation18_spill] sm:$0xff] %v3777_v24  ;;  %v1193_v44 = vpop.xlane.xlu0 %1192 }
 0x2a2   : > { %v1581_v58 = vrot.slane %v1193_v44, %v3775_v40  ;;  %v905_v44 = vadd.f32 %v3556_v55, %v3422_v53 }
 0x2a3   : > { %1392 = vadd.xlane.f32.xlu1 %v1164_v45  ;;  %v2982_v45 = vpop.eup %2981 }
 0x2a4   : > { %v3791_v57 = vsel %vm1587_vm3, %v1586_v50, %v1581_v58  ;;  %1264 = vadd.xlane.f32.xlu0 %v1100_v59  ;;  %v3793_v13 = vpop.xlane.xlu1 %1322  ;;  %v2984_v49 = vpop.eup %2983  ;;  %v921_v59 = vadd.f32 %v3556_v55, %v3440_v62  ;;  %v1188_v56 = vmul.f32 %v2982_v45, %v3346_v9  ;;  %2995 = vtanh.f32 %v905_v44 }
 0x2a5   : > { %v3795_v15 = vpop.xlane.xlu0 %1208  ;;  %v2986_v50 = vpop.eup %2985  ;;  %v1132_v28 = vmul.f32 %v2984_v49, %v3346_v9  ;;  %2997 = vtanh.f32 %v833_v60  ;;  %v1852_v60 = vrot.slane %v3760_v31, %v3770_v38 }
 0x2a6   : > { %v1071_v41 = vmul.f32 %v2986_v50, %v3346_v9  ;;  %2999 = vtanh.f32 %v921_v59 }
 0x2a7   : > { %1424 = vadd.xlane.f32.xlu1 %v1180_v36 }
 0x2a8   : > { %1280 = vadd.xlane.f32.xlu0 %v1108_v22  ;;  %v3803_v30 = vpop.xlane.xlu1 %1338  ;;  %v1773_v22 = vrot.slane %v3736_v61, %v3770_v38  ;;  %v841_v61 = vadd.f32 %v3556_v55, %v3451_v2 }
 0x2a9   : > { %4664 = vst [vmem:[#allocation19_spill] sm:$0xff] %v3803_v30  ;;  %v1225_v5 = vpop.xlane.xlu0 %1224 }
 0x2aa   : > { %v1690_v32 = vrot.slane %v1225_v5, %v3775_v40  ;;  %v2988_v5 = vpop.eup %2987  ;;  %3001 = vtanh.f32 %v841_v61 }
 0x2ab   : > { %1376 = vadd.xlane.f32.xlu1 %v1156_v25  ;;  %v2990_v29 = vpop.eup %2989  ;;  %3003 = vtanh.f32 %v897_v42 }
 0x2ac   : > { %v3813_v37 = vsel %vm1587_vm3, %v1694_v0, %v1690_v32  ;;  %1296 = vadd.xlane.f32.xlu0 %v1116_v10  ;;  %v3815_v4 = vpop.xlane.xlu1 %1354  ;;  %v2168_v32 = vrot.slane %v3730_v48, %v3770_v38  ;;  %v2992_v44 = vpop.eup %2991  ;;  %v849_v48 = vadd.f32 %v3566_v18, %v3451_v2 }
 0x2ad   : > { %v3819_v43 = vpop.xlane.xlu0 %1240  ;;  %v2994_v59 = vpop.eup %2993 }
 0x2ae   : > { %3005 = vtanh.f32 %v849_v48  ;;  %v1087_v31 = vmul.f32 %v2994_v59, %v3346_v9 }
 0x2af   : > { %1408 = vadd.xlane.f32.xlu1 %v1172_v39  ;;  %v1140_v39 = vmul.f32 %v2988_v5, %v3346_v9  ;;  %v816_v5 = vadd.f32 %v3417_v51, %v3571_v21 }
 0x2b0   : > { %1312 = vadd.xlane.f32.xlu0 %v1124_v47  ;;  %v1385_v58 = vpop.xlane.xlu1 %1384  ;;  %v1079_v47 = vmul.f32 %v2990_v29, %v3346_v9 }
 0x2b1   : > { %v2085_v36 = vrot.slane %v1385_v58, %v3775_v40  ;;  %v1257_v17 = vpop.xlane.xlu0 %1256  ;;  %v808_v58 = vadd.f32 %v3417_v51, %v3564_v54 }
 0x2b2   : > { %v1769_v26 = vrot.slane %v1257_v17, %v3775_v40  ;;  %v2996_v17 = vpop.eup %2995 }
 0x2b3   : > { %v3838_v25 = vsel %vm1587_vm3, %v2089_v1, %v2085_v36  ;;  %1440 = vadd.xlane.f32.xlu1 %v1188_v56  ;;  %v1151_v36 = vmul.f32 %v2992_v44, %v3346_v9  ;;  %3007 = vtanh.f32 %v808_v58  ;;  %v1167_v29 = vmul.f32 %v2996_v17, %v3346_v9 }
 0x2b4   : > { %v3842_v16 = vsel %vm1587_vm3, %v1773_v22, %v1769_v26  ;;  %1328 = vadd.xlane.f32.xlu0 %v1132_v28  ;;  %v1417_v0 = vpop.xlane.xlu1 %1416  ;;  %v857_v26 = vadd.f32 %v3556_v55, %v3479_v20  ;;  %v1931_v44 = vrot.slane %v3793_v13, %v3770_v38 }
 0x2b5   : > { %v2164_v10 = vrot.slane %v1417_v0, %v3775_v40  ;;  %v3849_v63 = vpop.xlane.xlu0 %1272 }
 0x2b6   : > { %3009 = vtanh.f32 %v857_v26 }
 0x2b7   : > { %v3855_v45 = vsel %vm1587_vm3, %v2168_v32, %v2164_v10  ;;  %1206 = vadd.xlane.f32.xlu1 %v1071_v41  ;;  %v2998_v41 = vpop.eup %2997  ;;  %v865_v32 = vadd.f32 %v3566_v18, %v3479_v20  ;;  %3011 = vtanh.f32 %v816_v5 }
 0x2b8   : > { %1344 = vadd.xlane.f32.xlu0 %v1140_v39  ;;  %v3858_v49 = vpop.xlane.xlu1 %1368  ;;  %v3000_v0 = vpop.eup %2999  ;;  %v1095_v42 = vmul.f32 %v2998_v41, %v3346_v9  ;;  %v824_v39 = vadd.f32 %v3420_v52, %v3564_v54 }
 0x2b9   : > { %v1289_v50 = vpop.xlane.xlu0 %1288  ;;  %v3002_v51 = vpop.eup %3001  ;;  %v1183_v48 = vmul.f32 %v3000_v0, %v3346_v9  ;;  %3013 = vtanh.f32 %v865_v32  ;;  %v840_v0 = vadd.f32 %v3451_v2, %v3564_v54  ;;  %v2010_v32 = vrot.slane %v3815_v4, %v3770_v38 }
 0x2ba   : > { %v1848_v1 = vrot.slane %v1289_v50, %v3775_v40  ;;  %v3004_v50 = vpop.eup %3003  ;;  %v1103_v13 = vmul.f32 %v3002_v51, %v3346_v9  ;;  %3015 = vtanh.f32 %v824_v39 }
 0x2bb   : > { %1222 = vadd.xlane.f32.xlu1 %v1079_v47  ;;  %v3006_v17 = vpop.eup %3005  ;;  %v1159_v26 = vmul.f32 %v3004_v50, %v3346_v9 }
 0x2bc   : > { %v3869_v56 = vsel %vm1587_vm3, %v1852_v60, %v1848_v1  ;;  %1366 = vadd.xlane.f32.xlu0 %v1151_v36  ;;  %v3871_v22 = vpop.xlane.xlu1 %1400  ;;  %v873_v60 = vadd.f32 %v3556_v55, %v3494_v35  ;;  %v832_v36 = vadd.f32 %v3420_v52, %v3571_v21  ;;  %v881_v55 = vadd.f32 %v3566_v18, %v3494_v35 }
 0x2bd   : > { %v3875_v28 = vpop.xlane.xlu0 %1304 }
 0x2be   : > { %3017 = vtanh.f32 %v873_v60 }
 0x2bf   : > { %1238 = vadd.xlane.f32.xlu1 %v1087_v31  ;;  %v3008_v31 = vpop.eup %3007  ;;  %3019 = vtanh.f32 %v832_v36  ;;  %v904_v36 = vadd.f32 %v3422_v53, %v3564_v54 }
 0x2c0   : > { %1398 = vadd.xlane.f32.xlu0 %v1167_v29  ;;  %v3881_v61 = vpop.xlane.xlu1 %1432  ;;  %v1111_v29 = vmul.f32 %v3006_v17, %v3346_v9  ;;  %v3010_v52 = vpop.eup %3009  ;;  %3021 = vtanh.f32 %v881_v55 }
 0x2c1   : > { %v1321_v10 = vpop.xlane.xlu0 %1320  ;;  %v3012_v39 = vpop.eup %3011  ;;  %v1119_v38 = vmul.f32 %v3010_v52, %v3346_v9  ;;  %3023 = vtanh.f32 %v840_v0  ;;  %v920_v0 = vadd.f32 %v3440_v62, %v3564_v54 }
 0x2c2   : > { %v1927_v47 = vrot.slane %v1321_v10, %v3775_v40  ;;  %v1078_v50 = vmul.f32 %v3012_v39, %v3346_v9 }
 0x2c3   : > { %1254 = vadd.xlane.f32.xlu1 %v1095_v42  ;;  %v1070_v42 = vmul.f32 %v3008_v31, %v3346_v9  ;;  %v3014_v4 = vpop.eup %3013 }
 0x2c4   : > { %v3893_v58 = vsel %vm1587_vm3, %v1931_v44, %v1927_v47  ;;  %1430 = vadd.xlane.f32.xlu0 %v1183_v48  ;;  %v3895_v59 = vpop.xlane.xlu1 %1198  ;;  %v888_v47 = vadd.f32 %v3460_v8, %v3564_v54  ;;  %v3016_v60 = vpop.eup %3015 }
 0x2c5   : > { %v3899_v1 = vpop.xlane.xlu0 %1336  ;;  %v1086_v55 = vmul.f32 %v3016_v60, %v3346_v9 }
 0x2c6   : > { %4665 = vst [vmem:[#allocation20_spill] sm:$0xff] %v3899_v1  ;;  %3025 = vtanh.f32 %v888_v47 }
 0x2c7   : > { %1270 = vadd.xlane.f32.xlu1 %v1103_v13 }
 0x2c8   : > { %1382 = vadd.xlane.f32.xlu0 %v1159_v26  ;;  %v3905_v5 = vpop.xlane.xlu1 %1214  ;;  %v1127_v26 = vmul.f32 %v3014_v4, %v3346_v9  ;;  %v3018_v31 = vpop.eup %3017 }
 0x2c9   : > { %v1353_v41 = vpop.xlane.xlu0 %1352 }
 0x2ca   : > { %v2006_v10 = vrot.slane %v1353_v41, %v3775_v40  ;;  %v848_v40 = vadd.f32 %v3451_v2, %v3571_v21  ;;  %v856_v2 = vadd.f32 %v3479_v20, %v3564_v54  ;;  %v3020_v41 = vpop.eup %3019 }
 0x2cb   : > { %1286 = vadd.xlane.f32.xlu1 %v1111_v29  ;;  %v1094_v39 = vmul.f32 %v3020_v41, %v3346_v9 }
 0x2cc   : > { %v3917_v51 = vsel %vm1587_vm3, %v2010_v32, %v2006_v10  ;;  %1204 = vadd.xlane.f32.xlu0 %v1070_v42  ;;  %v3919_v44 = vpop.xlane.xlu1 %1230  ;;  %3027 = vtanh.f32 %v848_v40  ;;  %v1135_v32 = vmul.f32 %v3018_v31, %v3346_v9  ;;  %v864_v10 = vadd.f32 %v3479_v20, %v3571_v21  ;;  %v3022_v42 = vpop.eup %3021 }
 0x2cd   : > { %v3923_v48 = vpop.xlane.xlu0 %1390  ;;  %3029 = vtanh.f32 %v904_v36  ;;  %v3024_v47 = vpop.eup %3023  ;;  %v896_v40 = vadd.f32 %v3460_v8, %v3571_v21  ;;  %v872_v20 = vadd.f32 %v3494_v35, %v3564_v54  ;;  %v912_v8 = vadd.f32 %v3422_v53, %v3571_v21 }
 0x2ce   : > { %3031 = vtanh.f32 %v856_v2  ;;  %v1102_v36 = vmul.f32 %v3024_v47, %v3346_v9  ;;  %v880_v54 = vadd.f32 %v3494_v35, %v3571_v21  ;;  %v913_v47 = vadd.f32 %v3566_v18, %v3422_v53 }
 0x2cf   : > { %1302 = vadd.xlane.f32.xlu1 %v1119_v38  ;;  %3033 = vtanh.f32 %v920_v0  ;;  %vm2240_vm3 = vcmask 1041409  }
 0x2d0   : > { %1220 = vadd.xlane.f32.xlu0 %v1078_v50  ;;  %v3929_v13 = vpop.xlane.xlu1 %1246  ;;  %v1143_v50 = vmul.f32 %v3022_v42, %v3346_v9  ;;  %3035 = vtanh.f32 %v864_v10  ;;  %v3026_v60 = vpop.eup %3025  ;;  %v1596_v42 = vadd.s32 4294967272, %v3746_v19 }
 0x2d1   : > { %v3933_v17 = vpop.xlane.xlu0 %1422  ;;  %3037 = vtanh.f32 %v896_v40 }
 0x2d2   : > { %3039 = vtanh.f32 %v872_v20 }
 0x2d3   : > { %1318 = vadd.xlane.f32.xlu1 %v1127_v26  ;;  %3041 = vtanh.f32 %v912_v8  ;;  %v3985_v8 = vsub.s32 %v1596_v42, %v3349_v14 }
 0x2d4   : > { %1236 = vadd.xlane.f32.xlu0 %v1086_v55  ;;  %v3939_v29 = vpop.xlane.xlu1 %1262  ;;  %v1150_v55 = vmul.f32 %v3026_v60, %v3346_v9  ;;  %3043 = vtanh.f32 %v880_v54 }
 0x2d5   : > { %v3943_v52 = vpop.xlane.xlu0 %1374  ;;  %3045 = vtanh.f32 %v913_v47  ;;  %v1704_v47 = vrot.slane %v3919_v44, %v3985_v8 }
 0x2d6   : > { %v3028_v26 = vpop.eup %3027 }
 0x2d7   : > { %1334 = vadd.xlane.f32.xlu1 %v1135_v32  ;;  %v3030_v41 = vpop.eup %3029  ;;  %v1110_v0 = vmul.f32 %v3028_v26, %v3346_v9  ;;  %v1589_v32 = vadd.s32 4294967280, %v3746_v19 }
 0x2d8   : > { %1252 = vadd.xlane.f32.xlu0 %v1094_v39  ;;  %v3949_v38 = vpop.xlane.xlu1 %1278  ;;  %v3032_v10 = vpop.eup %3031  ;;  %v1166_v35 = vmul.f32 %v3030_v41, %v3346_v9  ;;  %v928_v41 = vadd.f32 %v3440_v62, %v3571_v21 }
 0x2d9   : > { %v3953_v4 = vpop.xlane.xlu0 %1406  ;;  %v3034_v20 = vpop.eup %3033  ;;  %v1118_v60 = vmul.f32 %v3032_v10, %v3346_v9 }
 0x2da   : > { %v3036_v26 = vpop.eup %3035  ;;  %v1182_v54 = vmul.f32 %v3034_v20, %v3346_v9 }
 0x2db   : > { %1350 = vadd.xlane.f32.xlu1 %v1143_v50  ;;  %v927_v50 = vadd.f32 %v3464_v11, %v3440_v62  ;;  %v1126_v10 = vmul.f32 %v3036_v26, %v3346_v9 }
 0x2dc   : > { %1268 = vadd.xlane.f32.xlu0 %v1102_v36  ;;  %v3959_v2 = vpop.xlane.xlu1 %1294  ;;  %v3982_v36 = vsub.s32 %v1589_v32, %v3349_v14 }
 0x2dd   : > { %v3963_v31 = vpop.xlane.xlu0 %1438  ;;  %3047 = vtanh.f32 %v927_v50 }
 0x2df   : > { %1364 = vadd.xlane.f32.xlu1 %v1150_v55  ;;  %v929_v55 = vadd.f32 %v3566_v18, %v3440_v62 }
 0x2e0   : > { %1284 = vadd.xlane.f32.xlu0 %v1110_v0  ;;  %v3971_v39 = vpop.xlane.xlu1 %1310  ;;  %v3038_v0 = vpop.eup %3037 }
 0x2e1   : > { %v3975_v40 = vpop.xlane.xlu0 %1212  ;;  %v3040_v42 = vpop.eup %3039  ;;  %3049 = vtanh.f32 %v929_v55  ;;  %v1158_v62 = vmul.f32 %v3038_v0, %v3346_v9 }
 0x2e2   : > { %3051 = vtanh.f32 %v928_v41  ;;  %v3042_v20 = vpop.eup %3041  ;;  %v1783_v41 = vrot.slane %v3939_v29, %v3985_v8 }
 0x2e3   : > { %1396 = vadd.xlane.f32.xlu1 %v1166_v35  ;;  %v3044_v44 = vpop.eup %3043 }
 0x2e4   : > { %1300 = vadd.xlane.f32.xlu0 %v1118_v60  ;;  %v3987_v53 = vpop.xlane.xlu1 %1326  ;;  %v1134_v60 = vmul.f32 %v3040_v42, %v3346_v9 }
 0x2e5   : > { %v1229_v11 = vpop.xlane.xlu0 %1228 }
 0x2e6   : > { %v1699_v32 = vrot.slane %v1229_v11, %v3982_v36  ;;  %v1174_v11 = vmul.f32 %v3042_v20, %v3346_v9 }
 0x2e7   : > { %1428 = vadd.xlane.f32.xlu1 %v1182_v54  ;;  %v3046_v54 = vpop.eup %3045 }
 0x2e8   : > { %v1700_v18 = vsel %vm1594_vm4, %v1699_v32, %v3813_v37  ;;  %1316 = vadd.xlane.f32.xlu0 %v1126_v10  ;;  %v4000_v35 = vpop.xlane.xlu1 %1342  ;;  %v1142_v32 = vmul.f32 %v3044_v44, %v3346_v9  ;;  %v3048_v0 = vpop.eup %3047  ;;  %v1600_v44 = vrot.slane %v3895_v59, %v3985_v8 }
 0x2e9   : > { %4666 = vst [vmem:[#allocation21_spill] sm:$0xff] %v4000_v35  ;;  %v4002_v50 = vpop.xlane.xlu0 %1244  ;;  %v4006_v21 = vsel %vm1601_vm5, %v1704_v47, %v1700_v18  ;;  %v1189_v29 = vmul.f32 %v3048_v0, %v3346_v9 }
 0x2eb   : > { %1380 = vadd.xlane.f32.xlu1 %v1158_v62  ;;  %v1175_v62 = vmul.f32 %v3046_v54, %v3346_v9 }
 0x2ec   : > { %1332 = vadd.xlane.f32.xlu0 %v1134_v60  ;;  %v1359_v26 = vpop.xlane.xlu1 %1358  ;;  %v3050_v60 = vpop.eup %3049 }
 0x2ed   : > { %v1261_v37 = vpop.xlane.xlu0 %1260 }
 0x2ee   : > { %v1778_v55 = vrot.slane %v1261_v37, %v3982_v36  ;;  %v3052_v37 = vpop.eup %3051 }
 0x2ef   : > { %1412 = vadd.xlane.f32.xlu1 %v1174_v11  ;;  %v1190_v0 = vmul.f32 %v3052_v37, %v3346_v9 }
 0x2f0   : > { %v1779_v10 = vsel %vm1594_vm4, %v1778_v55, %v3842_v16  ;;  %1348 = vadd.xlane.f32.xlu0 %v1142_v32  ;;  %v1197_v42 = vpop.xlane.xlu1 %1196 }
 0x2f1   : > { %v4016_v47 = vpop.xlane.xlu0 %1276  ;;  %v1593_v18 = vrot.slane %v1197_v42, %v3982_v36  ;;  %v4021_v20 = vsel %vm1601_vm5, %v1783_v41, %v1779_v10  ;;  %v1191_v41 = vmul.f32 %v3050_v60, %v3346_v9  ;;  %v2178_v10 = vrot.slane %v3933_v17, %v3985_v8 }
 0x2f3   : > { %v1595_v16 = vsel %vm1594_vm4, %v1593_v18, %v3791_v57  ;;  %1414 = vadd.xlane.f32.xlu1 %v1175_v62  ;;  %v1862_v57 = vrot.slane %v3959_v2, %v3985_v8 }
 0x2f4   : > { %1442 = vadd.xlane.f32.xlu0 %v1189_v29  ;;  %v1421_v11 = vpop.xlane.xlu1 %1420  ;;  %v1602_v55 = vsel %vm1601_vm5, %v1600_v44, %v1595_v16  ;;  %v1941_v29 = vrot.slane %v3987_v53, %v3985_v8 }
 0x2f5   : > { %v1293_v32 = vpop.xlane.xlu0 %1292  ;;  %v2173_v54 = vrot.slane %v1421_v11, %v3982_v36 }
 0x2f6   : > { %v1857_v59 = vrot.slane %v1293_v32, %v3982_v36 }
 0x2f7   : > { %v2174_v42 = vsel %vm1594_vm4, %v2173_v54, %v3855_v45  ;;  %1446 = vadd.xlane.f32.xlu1 %v1191_v41 }
 0x2f8   : > { %v1858_v18 = vsel %vm1594_vm4, %v1857_v59, %v3869_v56  ;;  %1444 = vadd.xlane.f32.xlu0 %v1190_v0  ;;  %v4041_v62 = vpop.xlane.xlu1 %1372  ;;  %v4044_v60 = vsel %vm1601_vm5, %v2178_v10, %v2174_v42  ;;  %v2020_v10 = vrot.slane %v1359_v26, %v3985_v8  ;;  %v2099_v42 = vrot.slane %v3923_v48, %v3985_v8 }
 0x2f9   : > { %v4046_v17 = vpop.xlane.xlu0 %1308  ;;  %v4049_v9 = vsel %vm1601_vm5, %v1862_v57, %v1858_v18  ;;  %v1610_v48 = vadd.s32 4294967256, %v3746_v19 }
 0x2fc   : > { %v4051_v44 = vpop.xlane.xlu1 %1404 }
 0x2fd   : > { %v1325_v2 = vpop.xlane.xlu0 %1324 }
 0x2fe   : > { %v1936_v45 = vrot.slane %v1325_v2, %v3982_v36 }
 0x300   : > { %v1937_v56 = vsel %vm1594_vm4, %v1936_v45, %v3893_v58  ;;  %v4058_v37 = vpop.xlane.xlu1 %1436 }
 0x301   : > { %v4060_v16 = vpop.xlane.xlu0 %1340  ;;  %v4063_v11 = vsel %vm1601_vm5, %v1941_v29, %v1937_v56 }
 0x302   : > { %4667 = vst [vmem:[#allocation22_spill] sm:$0xff] %v4060_v16 }
 0x304   : > { %v1203_v32 = vpop.xlane.xlu1 %1202 }
 0x305   : > { %v1357_v54 = vpop.xlane.xlu0 %1356 }
 0x306   : > { %v2015_v41 = vrot.slane %v1357_v54, %v3982_v36 }
 0x308   : > { %v2016_v59 = vsel %vm1594_vm4, %v2015_v41, %v3917_v51  ;;  %v4069_v53 = vpop.xlane.xlu1 %1218 }
 0x309   : > { %v1389_v0 = vpop.xlane.xlu0 %1388  ;;  %v2021_v58 = vsel %vm1601_vm5, %v2020_v10, %v2016_v59 }
 0x30a   : > { %v2094_v57 = vrot.slane %v1389_v0, %v3982_v36  ;;  %v1603_v36 = vadd.s32 4294967264, %v3746_v19  ;;  %v1613_v0 = vsub.s32 %v1610_v48, %v3349_v14 }
 0x30c   : > { %v2095_v18 = vsel %vm1594_vm4, %v2094_v57, %v3838_v25  ;;  %v1235_v2 = vpop.xlane.xlu1 %1234  ;;  %v1606_v25 = vsub.s32 %v1603_v36, %v3349_v14  ;;  %v1614_v12 = vrot.slane %v1203_v32, %v1613_v0  ;;  %vm2242_vm4 = vcmask 1042434  }
 0x30d   : > { %v1363_v45 = vpop.xlane.xlu0 %1362  ;;  %v2100_v26 = vsel %vm1601_vm5, %v2099_v42, %v2095_v18  ;;  %v1714_v48 = vrot.slane %v1235_v2, %v1613_v0  ;;  %vm2244_vm5 = vcmask 1043459  }
 0x30e   : > { %v2030_v32 = vrot.slane %v1363_v45, %v1613_v0 }
 0x310   : > { %v4078_v29 = vpop.xlane.xlu1 %1250 }
 0x311   : > { %4668 = vst [vmem:[#allocation23_spill] sm:$0xff] %v4078_v29  ;;  %v1395_v51 = vpop.xlane.xlu0 %1394 }
 0x312   : > { %v2109_v2 = vrot.slane %v1395_v51, %v1613_v0 }
 0x314   : > { %v1267_v56 = vpop.xlane.xlu1 %1266 }
 0x315   : > { %v1427_v54 = vpop.xlane.xlu0 %1426  ;;  %v1793_v29 = vrot.slane %v1267_v56, %v1613_v0 }
 0x318   : > { %v4080_v41 = vpop.xlane.xlu1 %1282 }
 0x319   : > { %4669 = vst [vmem:[#allocation24_spill] sm:$0xff] %v4080_v41  ;;  %v4082_v10 = vpop.xlane.xlu0 %1378 }
 0x31a   : > { %4670 = vst [vmem:[#allocation25_spill] sm:$0xff] %v4082_v10 }
 0x31c   : > { %v1299_v8 = vpop.xlane.xlu1 %1298 }
 0x31d   : > { %v4086_v59 = vpop.xlane.xlu0 %1410 }
 0x31e   : > { %4671 = vst [vmem:[#allocation26_spill] sm:$0xff] %v4086_v59 }
 0x320   : > { %v4090_v57 = vpop.xlane.xlu1 %1314 }
 0x321   : > { %4672 = vst [vmem:[#allocation27_spill] sm:$0xff] %v4090_v57  ;;  %v1201_v42 = vpop.xlane.xlu0 %1200 }
 0x322   : > { %v1607_v18 = vrot.slane %v1201_v42, %v1606_v25 }
 0x324   : > { %v1609_v6 = vsel %vm1608_vm6, %v1607_v18, %v1602_v55  ;;  %v1331_v3 = vpop.xlane.xlu1 %1330 }
 0x325   : > { %v4093_v35 = vpop.xlane.xlu0 %1216  ;;  %v4096_v16 = vsel %vm1615_vm7, %v1614_v12, %v1609_v6 }
 0x328   : > { %v4098_v30 = vpop.xlane.xlu1 %1346 }
 0x329   : > { %4673 = vst [vmem:[#allocation28_spill] sm:$0xff] %v4098_v30  ;;  %v1233_v36 = vpop.xlane.xlu0 %1232 }
 0x32a   : > { %v1709_v1 = vrot.slane %v1233_v36, %v1606_v25 }
 0x32c   : > { %v1710_v57 = vsel %vm1608_vm6, %v1709_v1, %v4006_v21  ;;  %v1361_v59 = vpop.xlane.xlu1 %1360 }
 0x32d   : > { %v2025_v42 = vrot.slane %v1361_v59, %v1606_v25  ;;  %v4102_v41 = vpop.xlane.xlu0 %1248  ;;  %v4105_v55 = vsel %vm1615_vm7, %v1714_v48, %v1710_v57 }
 0x32f   : > { %v2026_v18 = vsel %vm1608_vm6, %v2025_v42, %v2021_v58  ;;  %v2188_v42 = vrot.slane %v1427_v54, %v1613_v0 }
 0x330   : > { %v1393_v6 = vpop.xlane.xlu1 %1392  ;;  %v4109_v12 = vsel %vm1615_vm7, %v2030_v32, %v2026_v18 }
 0x331   : > { %v2104_v30 = vrot.slane %v1393_v6, %v1606_v25  ;;  %v1265_v36 = vpop.xlane.xlu0 %1264 }
 0x332   : > { %v1788_v10 = vrot.slane %v1265_v36, %v1606_v25 }
 0x333   : > { %v2105_v1 = vsel %vm1608_vm6, %v2104_v30, %v2100_v26 }
 0x334   : > { %v1789_v21 = vsel %vm1608_vm6, %v1788_v10, %v4021_v20  ;;  %v1425_v59 = vpop.xlane.xlu1 %1424  ;;  %v4115_v57 = vsel %vm1615_vm7, %v2109_v2, %v2105_v1  ;;  %v1872_v10 = vrot.slane %v1299_v8, %v1613_v0  ;;  %v1951_v2 = vrot.slane %v1331_v3, %v1613_v0 }
 0x335   : > { %4674 = vst [vmem:[#allocation29_spill] sm:$0xff] %v4115_v57  ;;  %v2183_v45 = vrot.slane %v1425_v59, %v1606_v25  ;;  %v4117_v58 = vpop.xlane.xlu0 %1280  ;;  %v4120_v48 = vsel %vm1615_vm7, %v1793_v29, %v1789_v21 }
 0x337   : > { %v2184_v51 = vsel %vm1608_vm6, %v2183_v45, %v4044_v60 }
 0x338   : > { %v4124_v56 = vpop.xlane.xlu1 %1376  ;;  %v4127_v30 = vsel %vm1615_vm7, %v2188_v42, %v2184_v51 }
 0x339   : > { %4675 = vst [vmem:[#allocation30_spill] sm:$0xff] %v4127_v30  ;;  %v1297_v20 = vpop.xlane.xlu0 %1296 }
 0x33a   : > { %v1867_v26 = vrot.slane %v1297_v20, %v1606_v25  ;;  %v1631_v20 = vadd.s32 4294967232, %v3746_v19 }
 0x33c   : > { %v1868_v32 = vsel %vm1608_vm6, %v1867_v26, %v4049_v9  ;;  %v4131_v18 = vpop.xlane.xlu1 %1408  ;;  %v1652_v26 = vadd.s32 4294967208, %v3746_v19 }
 0x33d   : > { %v4133_v6 = vpop.xlane.xlu0 %1312  ;;  %v4136_v29 = vsel %vm1615_vm7, %v1872_v10, %v1868_v32  ;;  %v1624_v10 = vadd.s32 4294967240, %v3746_v19 }
 0x33e   : > { %4676 = vst [vmem:[#allocation31_spill] sm:$0xff] %v4136_v29  ;;  %v4180_v30 = vsub.s32 %v1652_v26, %v3349_v14 }
 0x340   : > { %v4138_v54 = vpop.xlane.xlu1 %1440 }
 0x341   : > { %v1329_v60 = vpop.xlane.xlu0 %1328 }
 0x342   : > { %v1946_v36 = vrot.slane %v1329_v60, %v1606_v25  ;;  %v1638_v25 = vadd.s32 4294967224, %v3746_v19  ;;  %v1645_v60 = vadd.s32 4294967216, %v3746_v19 }
 0x344   : > { %v1947_v1 = vsel %vm1608_vm6, %v1946_v36, %v4063_v11  ;;  %v1207_v21 = vpop.xlane.xlu1 %1206  ;;  %v1617_v11 = vadd.s32 4294967248, %v3746_v19  ;;  %v4165_v32 = vsub.s32 %v1638_v25, %v3349_v14  ;;  %v1666_v36 = vadd.s32 4294967192, %v3746_v19 }
 0x345   : > { %v4142_v8 = vpop.xlane.xlu0 %1344  ;;  %v4145_v9 = vsel %vm1615_vm7, %v1951_v2, %v1947_v1  ;;  %v1659_v25 = vadd.s32 4294967200, %v3746_v19  ;;  %vm2246_vm6 = vcmask 1044484   ;;  %vm2248_vm7 = vcmask 1045509  }
 0x346   : > { %4677 = vst [vmem:[#allocation32_spill] sm:$0xff] %v4142_v8  ;;  %4678 = vst [vmem:[#allocation33_spill] sm:$0xff] %v4145_v9  ;;  %v4174_v8 = vsub.s32 %v1617_v11, %v3349_v14  ;;  %v4177_v9 = vsub.s32 %v1631_v20, %v3349_v14  ;;  %v1642_v29 = vrot.slane %v3706_v33, %v4165_v32 }
 0x347   : > { %v4191_v11 = vsub.s32 %v1645_v60, %v3349_v14  ;;  %v4194_v20 = vsub.s32 %v1666_v36, %v3349_v14  ;;  %v4212_v7 = vsub.s32 %v1659_v25, %v3349_v14  ;;  %v1680_v25 = vadd.s32 4294967176, %v3746_v19 }
 0x348   : > { %v4147_v59 = vpop.xlane.xlu1 %1222  ;;  %v1635_v26 = vrot.slane %v3795_v15, %v4177_v9  ;;  %v1729_v33 = vrot.slane %v3819_v43, %v4177_v9 }
 0x349   : > { %v4149_v45 = vpop.xlane.xlu0 %1366  ;;  %v1649_v60 = vrot.slane %v3975_v40, %v4191_v11  ;;  %v1673_v40 = vadd.s32 4294967184, %v3746_v19 }
 0x34c   : > { %v4151_v42 = vpop.xlane.xlu1 %1238 }
 0x34d   : > { %v4153_v51 = vpop.xlane.xlu0 %1398 }
 0x34e   : > { %4679 = vst [vmem:[#allocation34_spill] sm:$0xff] %v4153_v51 }
 0x350   : > { %v4156_v3 = vpop.xlane.xlu1 %1254 }
 0x351   : > { %v4158_v0 = vpop.xlane.xlu0 %1430 }
 0x352   : > { %4680 = vst [vmem:[#allocation35_spill] sm:$0xff] %v4158_v0  ;;  %v4184_v0 = vsub.s32 %v1624_v10, %v3349_v14 }
 0x354   : > { %v4169_v2 = vpop.xlane.xlu1 %1270  ;;  %v1628_v10 = vrot.slane %v1207_v21, %v4184_v0 }
 0x355   : > { %v4171_v1 = vpop.xlane.xlu0 %1382 }
 0x356   : > { %4681 = vst [vmem:[#allocation36_spill] sm:$0xff] %v4171_v1 }
 0x358   : > { %v4196_v57 = vpop.xlane.xlu1 %1286 }
 0x359   : > { %v1205_v51 = vpop.xlane.xlu0 %1204 }
 0x35a   : > { %v1621_v1 = vrot.slane %v1205_v51, %v4174_v8 }
 0x35c   : > { %v1623_v36 = vsel %vm1622_vm8, %v1621_v1, %v4096_v16  ;;  %v4221_v51 = vpop.xlane.xlu1 %1302  ;;  %v1656_v1 = vrot.slane %v3905_v5, %v4180_v30  ;;  %v4248_v5 = vsub.s32 %v1680_v25, %v3349_v14  ;;  %v1724_v25 = vrot.slane %v4151_v42, %v4184_v0  ;;  %v4685_v16 = vld [vmem:[#allocation24_spill] sm:$0xff] }
 0x35d   : > { %v1630_v21 = vsel %vm1629_vm9, %v1628_v10, %v1623_v36  ;;  %v1221_v34 = vpop.xlane.xlu0 %1220  ;;  %v1663_v10 = vrot.slane %v4093_v35, %v4212_v7  ;;  %v1744_v35 = vrot.slane %v3929_v13, %v4180_v30 }
 0x35e   : > { %v1637_v24 = vsel %vm1636_vm10, %v1635_v26, %v1630_v21  ;;  %v1670_v21 = vrot.slane %v4069_v53, %v4194_v20  ;;  %v1823_v53 = vrot.slane %v3949_v38, %v4180_v30  ;;  %v1739_v26 = vrot.slane %v4002_v50, %v4191_v11  ;;  %v4684_v50 = vld [vmem:[#allocation25_spill] sm:$0xff] }
 0x35f   : > { %v1644_v15 = vsel %vm1643_vm11, %v1642_v29, %v1637_v24 }
 0x360   : > { %v1651_v36 = vsel %vm1650_vm12, %v1649_v60, %v1644_v15  ;;  %v4241_v43 = vpop.xlane.xlu1 %1318 }
 0x361   : > { %v1658_v24 = vsel %vm1657_vm13, %v1656_v1, %v1651_v36  ;;  %v1237_v29 = vpop.xlane.xlu0 %1236 }
 0x362   : > { %v1665_v60 = vsel %vm1664_vm14, %v1663_v10, %v1658_v24  ;;  %v1719_v15 = vrot.slane %v1237_v29, %v4174_v8  ;;  %v4269_v10 = vsub.s32 %v1673_v40, %v3349_v14  ;;  %v2055_v14 = vrot.slane %v4041_v62, %v4191_v11 }
 0x363   : > { %v1672_v1 = vsel %vm1671_vm15, %v1670_v21, %v1665_v60  ;;  %v1818_v60 = vrot.slane %v4016_v47, %v4191_v11  ;;  %v4697_v62 = vrot.slane %v3871_v22, %v4177_v9  ;;  %v4700_v22 = vrot.slane %v3875_v28, %v4177_v9 }
 0x364   : > { %v1720_v24 = vsel %vm1622_vm8, %v1719_v15, %v4105_v55  ;;  %v4273_v29 = vpop.xlane.xlu1 %1334  ;;  %v1684_v15 = vrot.slane %v4147_v59, %v4248_v5  ;;  %v4705_v28 = vrot.slane %v4046_v17, %v4191_v11  ;;  %v4709_v17 = vrot.slane %v3971_v39, %v4180_v30 }
 0x365   : > { %v1725_v42 = vsel %vm1629_vm9, %v1724_v25, %v1720_v24  ;;  %v1253_v21 = vpop.xlane.xlu0 %1252  ;;  %v4682_v25 = vrot.slane %v3726_v46, %v4165_v32  ;;  %v4683_v24 = vld [vmem:[#allocation23_spill] sm:$0xff]  ;;  %v1833_v46 = vrot.slane %v4685_v16, %v4194_v20  ;;  %v1764_v16 = vrot.slane %v4156_v3, %v4248_v5 }
 0x366   : > { %v1730_v40 = vsel %vm1636_vm10, %v1729_v33, %v1725_v42  ;;  %v1754_v13 = vrot.slane %v4683_v24, %v4194_v20  ;;  %v1749_v33 = vrot.slane %v4102_v41, %v4212_v7  ;;  %v1677_v42 = vrot.slane %v1221_v34, %v4269_v10 }
 0x367   : > { %v1735_v47 = vsel %vm1643_vm11, %v4682_v25, %v1730_v40  ;;  %v4686_v40 = vld [vmem:[#allocation26_spill] sm:$0xff]  ;;  %v1803_v25 = vrot.slane %v4169_v2, %v4184_v0 }
 0x368   : > { %v1740_v36 = vsel %vm1650_vm12, %v1739_v26, %v1735_v47  ;;  %v4299_v55 = vpop.xlane.xlu1 %1350  ;;  %v1679_v41 = vsel %vm1678_vm1, %v1677_v42, %v1672_v1  ;;  %v1759_v26 = vrot.slane %v1253_v21, %v4269_v10  ;;  %v4687_v1 = vld [vmem:[#allocation27_spill] sm:$0xff]  ;;  %v1828_v21 = vrot.slane %v4117_v58, %v4212_v7 }
 0x369   : > { %v1745_v24 = vsel %vm1657_vm13, %v1744_v35, %v1740_v36  ;;  %v1269_v19 = vpop.xlane.xlu0 %1268  ;;  %v1912_v36 = vrot.slane %v4687_v1, %v4194_v20  ;;  %v1686_v3 = vsel %vm1685_vm2, %v1684_v15, %v1679_v41  ;;  %v2040_v58 = vrot.slane %v4149_v45, %v4184_v0  ;;  %v4717_v1 = vld [vmem:[#allocation19_spill] sm:$0xff] }
 0x36a   : > { %v1750_v34 = vsel %vm1664_vm14, %v1749_v33, %v1745_v24  ;;  %v1798_v47 = vrot.slane %v1269_v19, %v4174_v8  ;;  %v2144_v41 = vrot.slane %v4131_v18, %v4212_v7 }
 0x36b   : > { %v1755_v35 = vsel %vm1671_vm15, %v1754_v13, %v1750_v34  ;;  %v2065_v34 = vrot.slane %v4124_v56, %v4212_v7 }
 0x36c   : > { %v1760_v19 = vsel %vm1678_vm1, %v1759_v26, %v1755_v35  ;;  %v1799_v59 = vsel %vm1622_vm8, %v1798_v47, %v4120_v48  ;;  %v1365_v33 = vpop.xlane.xlu1 %1364  ;;  %v4688_v48 = vrot.slane %v3849_v63, %v4177_v9  ;;  %v4689_v47 = vrot.slane %v3749_v23, %v4165_v32  ;;  %v4690_v63 = vld [vmem:[#allocation34_spill] sm:$0xff] }
 0x36d   : > { %v1765_v42 = vsel %vm1685_vm2, %v1764_v16, %v1760_v19  ;;  %v1804_v2 = vsel %vm1629_vm9, %v1803_v25, %v1799_v59  ;;  %v2035_v13 = vrot.slane %v1365_v33, %v4174_v8  ;;  %v1285_v24 = vpop.xlane.xlu0 %1284  ;;  %v1907_v25 = vrot.slane %v4133_v6, %v4212_v7 }
 0x36e   : > { %v2241_v26 = vsel %vm2240_vm3, %v1765_v42, %v1686_v3  ;;  %v1809_v15 = vsel %vm1636_vm10, %v4688_v48, %v1804_v2  ;;  %v2223_v16 = vrot.slane %v4138_v54, %v4212_v7  ;;  %v2119_v35 = vrot.slane %v4690_v63, %v4184_v0  ;;  %v4692_v2 = vld [vmem:[#allocation16_spill] sm:$0xff] }
 0x36f   : > { %v1814_v56 = vsel %vm1643_vm11, %v4689_v47, %v1809_v15  ;;  %v2036_v45 = vsel %vm1622_vm8, %v2035_v13, %v4109_v12  ;;  %v1843_v6 = vrot.slane %v4196_v57, %v4248_v5  ;;  %v4691_v23 = vrot.slane %v3858_v49, %v4177_v9 }
 0x370   : > { %v2041_v19 = vsel %vm1629_vm9, %v2040_v58, %v2036_v45  ;;  %v1819_v18 = vsel %vm1650_vm12, %v1818_v60, %v1814_v56  ;;  %v1397_v59 = vpop.xlane.xlu1 %1396  ;;  %v4693_v60 = vrot.slane %v4692_v2, %v4165_v32  ;;  %v1838_v58 = vrot.slane %v1285_v24, %v4269_v10  ;;  %v4695_v56 = vld [vmem:[#allocation31_spill] sm:$0xff] }
 0x371   : > { %v2046_v33 = vsel %vm1636_vm10, %v4691_v23, %v2041_v19  ;;  %v1824_v12 = vsel %vm1657_vm13, %v1823_v53, %v1819_v18  ;;  %v2114_v3 = vrot.slane %v1397_v59, %v4174_v8  ;;  %v1301_v42 = vpop.xlane.xlu0 %1300  ;;  %v1882_v48 = vrot.slane %v4221_v51, %v4184_v0  ;;  %v4694_v53 = vld [vmem:[#allocation29_spill] sm:$0xff]  ;;  %v4698_v23 = vld [vmem:[#allocation35_spill] sm:$0xff] }
 0x372   : > { %v2051_v13 = vsel %vm1643_vm11, %v4693_v60, %v2046_v33  ;;  %v1829_v57 = vsel %vm1664_vm14, %v1828_v21, %v1824_v12  ;;  %v1877_v49 = vrot.slane %v1301_v42, %v4174_v8  ;;  %v4696_v51 = vrot.slane %v3943_v52, %v4180_v30  ;;  %v4701_v42 = vld [vmem:[#allocation18_spill] sm:$0xff] }
 0x373   : > { %v1834_v38 = vsel %vm1671_vm15, %v1833_v46, %v1829_v57  ;;  %v2115_v15 = vsel %vm1622_vm8, %v2114_v3, %v4694_v53  ;;  %v2056_v47 = vsel %vm1650_vm12, %v2055_v14, %v2051_v13  ;;  %v2198_v33 = vrot.slane %v4698_v23, %v4184_v0  ;;  %v4703_v13 = vld [vmem:[#allocation30_spill] sm:$0xff] }
 0x374   : > { %v1839_v21 = vsel %vm1678_vm1, %v1838_v58, %v1834_v38  ;;  %v2120_v24 = vsel %vm1629_vm9, %v2119_v35, %v2115_v15  ;;  %v1878_v45 = vsel %vm1622_vm8, %v1877_v49, %v4695_v56  ;;  %v1429_v63 = vpop.xlane.xlu1 %1428  ;;  %v2061_v46 = vsel %vm1657_vm13, %v4696_v51, %v2056_v47 }
 0x375   : > { %v1844_v19 = vsel %vm1685_vm2, %v1843_v6, %v1839_v21  ;;  %v2125_v14 = vsel %vm1636_vm10, %v4697_v62, %v2120_v24  ;;  %v1883_v18 = vsel %vm1629_vm9, %v1882_v48, %v1878_v45  ;;  %v2193_v35 = vrot.slane %v1429_v63, %v4174_v8  ;;  %v1317_v59 = vpop.xlane.xlu0 %1316  ;;  %v4710_v63 = vld [vmem:[#allocation17_spill] sm:$0xff] }
 0x376   : > { %v2243_v12 = vsel %vm2242_vm4, %v1844_v19, %v2241_v26  ;;  %v4699_v52 = vrot.slane %v3753_v27, %v4165_v32  ;;  %v1888_v3 = vsel %vm1636_vm10, %v4700_v22, %v1883_v18  ;;  %v4702_v2 = vrot.slane %v4701_v42, %v4165_v32  ;;  %v4719_v42 = vld [vmem:[#allocation21_spill] sm:$0xff] }
 0x377   : > { %v2194_v57 = vsel %vm1622_vm8, %v2193_v35, %v4703_v13  ;;  %v2066_v26 = vsel %vm1664_vm14, %v2065_v34, %v2061_v46  ;;  %v4704_v27 = vrot.slane %v4051_v44, %v4191_v11  ;;  %v4706_v38 = vrot.slane %v4684_v50, %v4194_v20  ;;  %v4720_v13 = vld [vmem:[#allocation32_spill] sm:$0xff] }
 0x378   : > { %v2130_v6 = vsel %vm1643_vm11, %v4699_v52, %v2125_v14  ;;  %v1893_v60 = vsel %vm1643_vm11, %v4702_v2, %v1888_v3  ;;  %v2199_v49 = vsel %vm1629_vm9, %v2198_v33, %v2194_v57  ;;  %v1381_v15 = vpop.xlane.xlu1 %1380  ;;  %v4707_v34 = vrot.slane %v3953_v4, %v4180_v30 }
 0x379   : > { %v2135_v58 = vsel %vm1650_vm12, %v4704_v27, %v2130_v6  ;;  %v1898_v48 = vsel %vm1650_vm12, %v4705_v28, %v1893_v60  ;;  %v2071_v53 = vsel %vm1671_vm15, %v4706_v38, %v2066_v26  ;;  %v4708_v47 = vrot.slane %v3881_v61, %v4177_v9  ;;  %v1333_v56 = vpop.xlane.xlu0 %1332  ;;  %v4718_v6 = vld [vmem:[#allocation22_spill] sm:$0xff]  ;;  %v4721_v26 = vld [vmem:[#allocation28_spill] sm:$0xff] }
 0x37a   : > { %v2140_v44 = vsel %vm1657_vm13, %v4707_v34, %v2135_v58  ;;  %v1903_v24 = vsel %vm1657_vm13, %v4709_v17, %v1898_v48  ;;  %v1917_v50 = vrot.slane %v1317_v59, %v4269_v10  ;;  %v4711_v4 = vrot.slane %v4710_v63, %v4165_v32  ;;  %v4715_v59 = vld [vmem:[#allocation33_spill] sm:$0xff]  ;;  %v4722_v34 = vld [vmem:[#allocation36_spill] sm:$0xff] }
 0x37b   : > { %v2204_v21 = vsel %vm1636_vm10, %v4708_v47, %v2199_v49  ;;  %v2145_v45 = vsel %vm1664_vm14, %v2144_v41, %v2140_v44  ;;  %v1908_v46 = vsel %vm1664_vm14, %v1907_v25, %v1903_v24  ;;  %v1956_v61 = vrot.slane %v1333_v56, %v4174_v8 }
 0x37c   : > { %v2209_v51 = vsel %vm1643_vm11, %v4711_v4, %v2204_v21  ;;  %v4712_v19 = vrot.slane %v4686_v40, %v4194_v20  ;;  %v1922_v62 = vrot.slane %v4241_v43, %v4248_v5  ;;  %v1961_v41 = vrot.slane %v4273_v29, %v4184_v0  ;;  %v4714_v40 = vld [vmem:[#allocation20_spill] sm:$0xff]  ;;  %v1413_v23 = vpop.xlane.xlu1 %1412 }
 0x37d   : > { %v1913_v14 = vsel %vm1671_vm15, %v1912_v36, %v1908_v46  ;;  %v4713_v25 = vrot.slane %v4058_v37, %v4191_v11  ;;  %v1966_v18 = vrot.slane %v4714_v40, %v4177_v9  ;;  %v1957_v43 = vsel %vm1622_vm8, %v1956_v61, %v4715_v59  ;;  %v1349_v52 = vpop.xlane.xlu0 %1348 }
 0x37e   : > { %v2150_v39 = vsel %vm1671_vm15, %v4712_v19, %v2145_v45  ;;  %v1918_v35 = vsel %vm1678_vm1, %v1917_v50, %v1913_v14  ;;  %v4716_v0 = vrot.slane %v3963_v31, %v4180_v30  ;;  %v1971_v36 = vrot.slane %v4717_v1, %v4165_v32 }
 0x37f   : > { %v2214_v8 = vsel %vm1650_vm12, %v4713_v25, %v2209_v51  ;;  %v1923_v37 = vsel %vm1685_vm2, %v1922_v62, %v1918_v35  ;;  %v1962_v33 = vsel %vm1629_vm9, %v1961_v41, %v1957_v43  ;;  %v1976_v22 = vrot.slane %v4718_v6, %v4191_v11 }
 0x380   : > { %v2219_v29 = vsel %vm1657_vm13, %v4716_v0, %v2214_v8  ;;  %v2245_v31 = vsel %vm2244_vm5, %v1923_v37, %v2243_v12  ;;  %v1967_v3 = vsel %vm1636_vm10, %v1966_v18, %v1962_v33  ;;  %v1981_v32 = vrot.slane %v4719_v42, %v4180_v30 }
 0x381   : > { %v2224_v9 = vsel %vm1664_vm14, %v2223_v16, %v2219_v29  ;;  %v2075_v2 = vrot.slane %v1381_v15, %v4269_v10  ;;  %v1972_v60 = vsel %vm1643_vm11, %v1971_v36, %v1967_v3  ;;  %v1986_v57 = vrot.slane %v4720_v13, %v4212_v7  ;;  %v1415_v16 = vpop.xlane.xlu1 %1414  ;;  %v1443_v27 = vpop.xlane.xlu0 %1442 }
 0x382   : > { %v1977_v54 = vsel %vm1650_vm12, %v1976_v22, %v1972_v60  ;;  %v1991_v11 = vrot.slane %v4721_v26, %v4194_v20  ;;  %v2001_v30 = vrot.slane %v4299_v55, %v4248_v5  ;;  %v2154_v58 = vrot.slane %v1413_v23, %v4269_v10 }
 0x383   : > { %v1982_v12 = vsel %vm1657_vm13, %v1981_v32, %v1977_v54  ;;  %v1996_v28 = vrot.slane %v1349_v52, %v4269_v10  ;;  %v2076_v7 = vsel %vm1678_vm1, %v2075_v2, %v2071_v53  ;;  %v2159_v38 = vrot.slane %v1415_v16, %v4248_v5 }
 0x384   : > { %v1987_v49 = vsel %vm1664_vm14, %v1986_v57, %v1982_v12  ;;  %v2228_v15 = vrot.slane %v1443_v27, %v4194_v20  ;;  %v2080_v44 = vrot.slane %v4722_v34, %v4248_v5  ;;  %vm2250_vm8 = vcmask 1046534  }
 0x385   : > { %v1992_v48 = vsel %vm1671_vm15, %v1991_v11, %v1987_v49  ;;  %v1447_v55 = vpop.xlane.xlu1 %1446  ;;  %v1445_v24 = vpop.xlane.xlu0 %1444  ;;  %v2155_v50 = vsel %vm1678_vm1, %v2154_v58, %v2150_v39  ;;  %vm2252_vm9 = vcmask 1047559  }
 0x386   : > { %v1997_v47 = vsel %vm1678_vm1, %v1996_v28, %v1992_v48  ;;  %v2238_v17 = vrot.slane %v1447_v55, %v4248_v5  ;;  %v2081_v53 = vsel %vm1685_vm2, %v2080_v44, %v2076_v7  ;;  %v2233_v20 = vrot.slane %v1445_v24, %v4269_v10 }
 0x387   : > { %v2002_v21 = vsel %vm1685_vm2, %v2001_v30, %v1997_v47  ;;  %v2160_v45 = vsel %vm1685_vm2, %v2159_v38, %v2155_v50  ;;  %v2229_v4 = vsel %vm1671_vm15, %v2228_v15, %v2224_v9 }
 0x388   : > { %v2247_v56 = vsel %vm2246_vm6, %v2002_v21, %v2245_v31  ;;  %v2234_v46 = vsel %vm1678_vm1, %v2233_v20, %v2229_v4 }
 0x389   : > { %v2249_v63 = vsel %vm2248_vm7, %v2081_v53, %v2247_v56  ;;  %v2239_v5 = vsel %vm1685_vm2, %v2238_v17, %v2234_v46 }
 0x38a   : > { %v2251_v51 = vsel %vm2250_vm8, %v2160_v45, %v2249_v63 }
 0x38b   : > { %v2253_v61 = vsel %vm2252_vm9, %v2239_v5, %v2251_v51 }
 0x38c   : > { %2255 = vst [vmem:[#allocation2] sm:$0xff] %v2253_v61 }
 0x38d PF: > { %v2258_v19 = vld [vmem:[%s3341_s15] sm:$0xff]  ;;  %v4723_v39 = vmov 0.0|0.0   ;;  %v4724_v10 = vmov 0.0   ;;  %v3189_v62 = vmov 0   ;;  %v4725_v41 = vlaneseq  ;;  %v2278_v59 = vld [vmem:[%s3336_s21 + $0x8] sm:$0xff]  ;;  %v2279_v43 = vld [vmem:[%s3336_s21 + $0x10] sm:$0xff] }
 0x38e   : > { %2705 = vmatprep.subr.bf16.mxu0 %v4723_v39  ;;  %2692 = vmatprep.mubr.msk.f32.mxu0 %vm3186_vm0, %v4724_v10  ;;  %v2277_v35 = vld [vmem:[%s3336_s21] sm:$0xff]  ;;  %v2280_v0 = vld [vmem:[%s3336_s21 + $0x18] sm:$0xff]  ;;  %v2282_v36 = vld [vmem:[%s3336_s21 + $0x28] sm:$0xff]  ;;  %s2575_s15 = sshll.u32 %s3174_s16, 7  ;;  %s2370_s22 = scalar_lea.sflag [#allocation8], %s3301_s27 }
 0x38f   : > { %3053 = vset.pattern.permute.xlu0 %v3189_v62  ;;  %v2257_v14 = vand.u32 127, %v4725_v41  ;;  %v2706_v23 = vpack.c.bf16 %v2278_v59, %v2277_v35  ;;  %v2709_v29 = vpack.c.bf16 %v2280_v0, %v2279_v43  ;;  %v2281_v1 = vld [vmem:[%s3336_s21 + $0x20] sm:$0xff]  ;;  %v2283_v33 = vld [vmem:[%s3336_s21 + $0x30] sm:$0xff]  ;;  %v2284_v52 = vld [vmem:[%s3336_s21 + $0x38] sm:$0xff]  ;;  %s4552_s20 = scalar_lea.hbm %s4637_s9, %s2575_s15  ;;  %s3190_s10 = smov [#allocation7]  }
 0x390   : > { %2261 = vperm.xlu0 %3053, %v2258_v19   ;;  %v2712_v37 = vpack.c.bf16 %v2282_v36, %v2281_v1  ;;  %v2715_v9 = vpack.c.bf16 %v2284_v52, %v2283_v33  ;;  %v2285_v6 = vld [vmem:[%s3336_s21 + $0x40] sm:$0xff]  ;;  %v2286_v22 = vld [vmem:[%s3336_s21 + $0x48] sm:$0xff]  ;;  %v2287_v60 = vld [vmem:[%s3336_s21 + $0x50] sm:$0xff]  ;;  %s3074_s5 = sshll.u32 %s3190_s10, 4  ;;  %s3075_s5 = int_to_ptr.vmem [resolvable:$false] %s3074_s5 }
 0x391   : > { %vm2265_vm10 = vcmp.lt.s32.totalorder %v2257_v14, 16  ;;  %2707 = vmatpush3.bf16.msra.mxu0 %v2706_v23  ;;  %v2718_v31 = vpack.c.bf16 %v2286_v22, %v2285_v6  ;;  %v2288_v13 = vld [vmem:[%s3336_s21 + $0x58] sm:$0xff]  ;;  %v2289_v54 = vld [vmem:[%s3336_s21 + $0x60] sm:$0xff]  ;;  %v2290_v16 = vld [vmem:[%s3336_s21 + $0x68] sm:$0xff]  ;;  %s3076_s26 = scalar_lea.vmem %s3075_s5, 256 }
 0x392   : > { %2708 = vmatprep.subr.bf16.mxu0 %v4723_v39  ;;  %v2721_v57 = vpack.c.bf16 %v2288_v13, %v2287_v60  ;;  %v2724_v26 = vpack.c.bf16 %v2290_v16, %v2289_v54  ;;  %v2291_v11 = vld [vmem:[%s3336_s21 + $0x70] sm:$0xff]  ;;  %v2292_v12 = vld [vmem:[%s3336_s21 + $0x78] sm:$0xff]  ;;  %s2398_s21 = sshll.u32 %s3374_s19, 4  ;;  %s2399_s21 = int_to_ptr.vmem [resolvable:$true] %s2398_s21 }
 0x393   : > { %v2259_v25 = vld [vmem:[#allocation2] sm:$0xff]  ;;  %v2727_v27 = vpack.c.bf16 %v2292_v12, %v2291_v11  ;;  %s3070_s24 = scalar_lea.vmem %s2399_s21, 128  ;;  %p3077_p7 = scmp.lt.s32.totalorder %s2399_s21, %s3075_s5 }
 0x394   : > { %p3071_p4 = scmp.ne.s32.totalorder %s2399_s21, %s3070_s24  ;;  %p3078_p8 = scmp.lt.s32.totalorder %s3076_s26, %s3070_s24 }
 0x395   : > { %2710 = vmatpush3.bf16.msra.mxu0 %v2709_v29 }
 0x396   : > { %2711 = vmatprep.subr.bf16.mxu0 %v4723_v39  ;;  %p3072_p5 = pnand %p3071_p4, %p3285_p9  ;;  %p3079_p10 = por %p3078_p8, %p3077_p7 }
 0x398   : > { %p3073_p6 = pneg %p3072_p5 }
 0x399   : > { %2713 = vmatpush3.bf16.msra.mxu0 %v2712_v37 }
 0x39a   : > { %2714 = vmatprep.subr.bf16.mxu0 %v4723_v39  ;;  %p3080_p11 = pnand %p3079_p10, %p3073_p6 }
 0x39d   : > { %2716 = vmatpush3.bf16.msra.mxu0 %v2715_v9 }
 0x39e   : > { %2717 = vmatprep.subr.bf16.mxu0 %v4723_v39 }
 0x3a1   : > { %2719 = vmatpush3.bf16.msra.mxu0 %v2718_v31 }
 0x3a2   : > { %2720 = vmatprep.subr.bf16.mxu0 %v4723_v39 }
 0x3a5   : > { %2722 = vmatpush3.bf16.msra.mxu0 %v2721_v57 }
 0x3a6   : > { %2723 = vmatprep.subr.bf16.mxu0 %v4723_v39 }
 0x3a9   : > { %2725 = vmatpush3.bf16.msra.mxu0 %v2724_v26 }
 0x3aa   : > { %2726 = vmatprep.subr.bf16.mxu0 %v4723_v39 }
 0x3ad   : > { %2728 = vmatpush3.bf16.msra.mxu0 %v2727_v27 }
 0x40f   : > { %v2262_v8 = vpop.permute.xlu0 %2261 }
 0x410   : > { %vm2263_vm11 = vcmp.lt.s32.totalorder %v2257_v14, %v2262_v8 }
 0x411   : > { %v2264_v40 = vsel %vm2263_vm11, %v2259_v25, -1000000.0 }
 0x412   : > { %v2266_v18 = vsel %vm2265_vm10, %v2264_v40, -1e+30 }
 0x413   : > { %2267 = vmax.xlane.f32.xlu0 %v2266_v18 }
 0x4a0   : > { %v2268_v3 = vpop.xlane.xlu0 %2267 }
 0x4a1   : > { %v2269_v42 = vsub.f32 %v2266_v18, %v2268_v3 }
 0x4a3   : > { %v2270_v32 = vmul.f32 1.442695, %v2269_v42 }
 0x4a5   : > { %3054 = vpow2.f32 %v2270_v32 }
 0x4af   : > { %v3055_v2 = vpop.eup %3054 }
 0x4b0   : > { %2272 = vadd.xlane.f32.xlu1 %v3055_v2 }
 0x53d   : > { %v2273_v30 = vpop.xlane.xlu1 %2272 }
 0x53e   : > { %3056 = vrcp.f32 %v2273_v30 }
 0x548   : > { %v3057_v58 = vpop.eup %3056 }
 0x549   : > { %v2275_v49 = vmul.f32 %v3057_v58, %v3055_v2 }
 0x54b   : > { %2693 = vmatmul.mubr.f32.vlgmr.msra.gmra.mrb[0].mxu0 %v2275_v49  ;;  %2276 = vst [vmem:[%s3374_s19] sm:$0xff] %v2275_v49 }
 0x54c   : > { %3083 = shalt.err (!%p3080_p11)
}
 0x54d   : > { %s3084_s19 = scalar_lea.hbm %s4552_s20, 128  ;;  %s3088_s11 = scalar_lea.hbm %s4637_s9, 256 }
 0x54e   : > { %p3085_p12 = scmp.ne.s32.totalorder %s4552_s20, %s3084_s19  ;;  %p3089_p2 = scmp.lt.u32.totalorder %s4552_s20, %s4637_s9 }
 0x54f   : > { %p3090_p3 = scmp.lt.u32.totalorder %s3088_s11, %s3084_s19  ;;  %p3092_p5 = scmp.lt.u32.totalorder %s3084_s19, %s4552_s20 }
 0x550   : > { %p3086_p0 = pnand %p3085_p12, %p3285_p9 }
 0x551   : > { %p3091_p4 = por %p3090_p3, %p3089_p2 }
 0x552   : > { %p3087_p1 = pneg %p3086_p0 }
 0x553   : > { %p3093_p6 = por %p3092_p5, %p3091_p4 }
 0x555   : > { %p3094_p7 = pnand %p3093_p6, %p3087_p1 }
 0x557   : > { %3097 = shalt.err (!%p3094_p7)
}
 0x558   : > { %2732 = dma.vmem_to_hbm [thread:$0]  (%p3285_p9), %s2399_s21, 128, %s4552_s20, %s2370_s22  }
 0x559   : > { %s2384_s13 = sshll.u32 %s3370_s17, 4  ;;  %s4579_s5 = scalar_lea.hbm %s4636_s8, %s2575_s15  ;;  %s4581_s13 = int_to_ptr.vmem [resolvable:$true] %s2384_s13 }
 0x55a   : > { %s2365_s26 = scalar_lea.sflag [#allocation6], %s3301_s27  ;;  %s3098_s19 = scalar_lea.vmem %s4581_s13, 128 }
 0x55b   : > { %p3099_p8 = scmp.ne.s32.totalorder %s4581_s13, %s3098_s19  ;;  %s3191_s16 = smov [#allocation5]  }
 0x55c   : > { %s3102_s20 = sshll.u32 %s3191_s16, 4  ;;  %s3103_s20 = int_to_ptr.vmem [resolvable:$false] %s3102_s20 }
 0x55d   : > { %p3100_p10 = pnand %p3099_p8, %p3285_p9  ;;  %s3104_s21 = scalar_lea.vmem %s3103_s20, 256 }
 0x55e   : > { %p3105_p12 = scmp.lt.s32.totalorder %s4581_s13, %s3103_s20  ;;  %p3106_p0 = scmp.lt.s32.totalorder %s3104_s21, %s3098_s19 }
 0x55f   : > { %p3101_p11 = pneg %p3100_p10 }
 0x560   : > { %p3107_p1 = por %p3106_p0, %p3105_p12 }
 0x562   : > { %p3108_p2 = pnand %p3107_p1, %p3101_p11 }
 0x61e   : > { %v2359_v28 = vpop.f32.mrb[0].mxu0 }
 0x61f   : > { %2363 = vst [vmem:[%s3370_s17] sm:$0xff] %v2359_v28  ;;  %v2694_v7 = vpop.f32.mrb[1].mxu0 }
 0x620   : > { %3111 = shalt.err (!%p3108_p2)
}
 0x621   : > { %s3112_s27 = scalar_lea.hbm %s4579_s5, 128  ;;  %s3116_s22 = scalar_lea.hbm %s4636_s8, 256 }
 0x622   : > { %p3113_p3 = scmp.ne.s32.totalorder %s4579_s5, %s3112_s27  ;;  %p3117_p6 = scmp.lt.u32.totalorder %s4579_s5, %s4636_s8 }
 0x623   : > { %p3118_p7 = scmp.lt.u32.totalorder %s3116_s22, %s3112_s27  ;;  %p3120_p10 = scmp.lt.u32.totalorder %s3112_s27, %s4579_s5 }
 0x624   : > { %p3114_p4 = pnand %p3113_p3, %p3285_p9 }
 0x625   : > { %p3119_p8 = por %p3118_p7, %p3117_p6 }
 0x626   : > { %p3115_p5 = pneg %p3114_p4 }
 0x627   : > { %p3121_p11 = por %p3120_p10, %p3119_p8 }
 0x629   : > { %p3122_p12 = pnand %p3121_p11, %p3115_p5 }
 0x62b   : > { %3125 = shalt.err (!%p3122_p12)
}
 0x62c   : > { %2731 = dma.vmem_to_hbm [thread:$0]  (%p3285_p9), %s4581_s13, 128, %s4579_s5, %s2365_s26  }
 0x62d PF: > { %p2742_p0 = scmp.ge.s32.totalorder %s3182_s18, 2  ;;  %s2410_s11 = sand.u32 1, %s3162_s14  }
 0x62e   : > { %s2411_s12 = scalar_lea.sflag [#allocation6], %s2410_s11 }
 0x62f   : > { %p2736_p1 = pnand %p2742_p0, %p3292_p13 }
 0x631   : > { %3153 = dma.done.wait (!%p2736_p1), %s2411_s12, 128  }
 0x632   : > { %3155 = vsyncadd (!%p2736_p1), %s2411_s12, 4294967168  ;;  %s2420_s28 = scalar_lea.sflag [#allocation8], %s2410_s11 }
 0x633   : > { %3157 = dma.done.wait (!%p2736_p1), %s2420_s28, 128  }
 0x634   : > { %3159 = vsyncadd (!%p2736_p1), %s2420_s28, 4294967168  ;;  %s32_s18 = sadd.s32 1, %s3182_s18   ;;  %s4726_s23 = sld [smem:[#allocation12_spill]] }
 0x635   : > { %p29_p2 = scmp.ge.s32.totalorder %s32_s18, 4   ;;  %s4727_s15 = sld [smem:[#allocation15_spill]] }
 0x636   : > { %s4728_s16 = sld [smem:[#allocation13_spill]]  ;;  %s4729_s17 = sld [smem:[#allocation14_spill]] }
 0x637   : > { %s4730_s14 = smov %s3166_s0  ;;  %31 = sbr.rel (!%p29_p2) target bundleno = 21 (0x15), region = 113 }
 0x63a   : > { %s4731_s0 = smov %s4726_s23 }
 0x63e   :  { %2425 = vsyncpa [#allocation6], 1 }
 0x63f   :  { %2427 = vsyncpa [#allocation6 + $0x1], 1 }
 0x640   :  { %2428 = vsyncpa [#allocation8], 1 }
 0x641   :  { %2430 = vsyncpa [#allocation8 + $0x1], 1 }

</bundles_post_ra>
